<compile_context>
chip_gen: v7x
topology: tpu7x:2x2x1
jax: 0.10.0
libtpu: 0.0.40
codegen_flags: <defaults>
</compile_context>

<pallas_src>
import numpy as np

import jax
import jax.numpy as jnp
from jax.experimental import pallas as pl
from jax.experimental.pallas import tpu as pltpu


_VMEM = pl.BlockSpec(memory_space=pltpu.MemorySpace.VMEM)


def _pick_bb(B, cap=16):
    """Largest batch tile <= cap dividing B while keeping >= 2 grid steps."""
    hi = min(cap, B // 2) if B >= 2 else 1
    for bb in range(max(hi, 1), 0, -1):
        if B % bb == 0 and B // bb >= 2:
            return bb
    return B  # B == 1


# ----------------------------------------------------------------------------
# Kernel 1: conv1 + bias + LeakyReLU, conv2 + bias, BN2 partial stats.
# Batch-tiled, "parallel" grid.
# ----------------------------------------------------------------------------
def _conv12_kernel(xw_ref, w1_ref, b1_ref, w2_ref, b2_ref, o_ref, st_ref):
    # xw_ref: [bb, 8, 8, 64] bf16  wrapper-built conv1 windows
    # w1_ref: [64, 128] bf16       K=(dR,dC,u,v), N=(row_par,col_par,cout)
    # w2_ref: [9, 128, 64] bf16    per-spatial-offset zero-padded weight blocks
    # o_ref : [bb*32, 128] f32     conv2+bias (pre-BN), lane-dense
    # st_ref: [1, 2, 128] f32      per-tile BN2 (sum, sumsq) per lane
    bb = xw_ref.shape[0]

    # conv1 (1->32, k4, s2, p1): one MXU pass emits all 4 output-parity
    # subgrids as 128 lanes; rows = (b, hh, ww) on the 8x8 superblock grid.
    p1 = xw_ref[...].reshape(bb * 64, 64)
    a1 = jnp.dot(p1, w1_ref[...], preferred_element_type=jnp.float32)
    a1 = a1 + b1_ref[...]
    a1 = jnp.where(a1 > 0, a1, 0.2 * a1)                      # LeakyReLU(0.2)
    a1 = a1.reshape(bb, 8, 8, 128)

    # zero pad (== conv2 padding of 1 on the 16x16 activation map)
    zr = jnp.zeros((bb, 1, 8, 128), jnp.float32)
    a1p = jnp.concatenate([zr, a1, zr], axis=1)               # [bb,10,8,128]
    zc = jnp.zeros((bb, 10, 1, 128), jnp.float32)
    a1p = jnp.concatenate([zc, a1p, zc], axis=2)              # [bb,10,10,128]

    # conv2 (32->64, k4, s2, p1): 9 full-lane unit-stride offset slices x
    # zero-padded weight blocks, accumulated on the MXU (no lane concats).
    acc = jnp.zeros((bb * 64, 64), jnp.float32)
    for t in range(9):
        r0, c0 = t // 3, t % 3
        blk = a1p[:, r0:r0 + 8, c0:c0 + 8, :]
        blk = blk.reshape(bb * 64, 128).astype(jnp.bfloat16)
        acc = acc + jnp.dot(blk, w2_ref[t], preferred_element_type=jnp.float32)
    a2 = acc + b2_ref[...]                                    # [bb*64, 64]

    # lane-dense (128) interface: pack top/bottom halves of the 8x8 grid into
    # the two 64-lane halves (one cheap lane concat, unmasked 128-lane store).
    a2 = a2.reshape(bb, 8, 8, 64)
    a2p = jnp.concatenate([a2[:, 0:4], a2[:, 4:8]], axis=-1)  # [bb,4,8,128]
    a2p = a2p.reshape(bb * 32, 128)
    o_ref[...] = a2p

    # BatchNorm2d(64) per-tile partial stats (per lane; halves folded in XLA).
    s = jnp.sum(a2p, axis=0, keepdims=True)
    sq = jnp.sum(a2p * a2p, axis=0, keepdims=True)
    st_ref[...] = jnp.concatenate([s, sq], axis=0)[None]


# ----------------------------------------------------------------------------
# Kernel 2: BN2 normalize + LeakyReLU, conv3 (stride-1 trick) + bias,
#           masked BN3 partial stats.  Batch-tiled, "parallel" grid.
# ----------------------------------------------------------------------------
def _conv3_kernel(a2_ref, sc2_ref, sh2_ref, w3_ref, b3_ref, o_ref, st_ref):
    # a2_ref: [bb*32, 128] f32   packed conv2 output
    # sc2/sh2: [1, 64] f32       precomputed BN2 batch-stat affine
    # w3_ref: [9, 64, 128] bf16  conv3 taps (stride-1 form)
    # o_ref : [bb*64, 128] f32   stride-1 conv3 + bias at all 64 positions
    # st_ref: [1, 2, 128] f32    BN3 (sum, sumsq), masked to the 16 valid
    #                            stride-2 positions per sample
    bb = a2_ref.shape[0] // 32
    x = a2_ref[...].reshape(bb, 4, 8, 128)
    a2 = jnp.concatenate([x[..., 0:64], x[..., 64:128]], axis=1)  # [bb,8,8,64]

    a2 = a2 * sc2_ref[...] + sh2_ref[...]                     # BN2 (batch stats)
    a2 = jnp.where(a2 > 0, a2, 0.2 * a2)                      # LeakyReLU(0.2)

    # conv3 (64->128, k3, p1) evaluated at stride 1; subsampling handled later.
    zr = jnp.zeros((bb, 1, 8, 64), jnp.float32)
    ap = jnp.concatenate([zr, a2, zr], axis=1)                # [bb,10,8,64]
    zc = jnp.zeros((bb, 10, 1, 64), jnp.float32)
    ap = jnp.concatenate([zc, ap, zc], axis=2)                # [bb,10,10,64]

    acc = jnp.zeros((bb * 64, 128), jnp.float32)
    for t in range(9):
        r0, c0 = t // 3, t % 3
        blk = ap[:, r0:r0 + 8, c0:c0 + 8, :]
        blk = blk.reshape(bb * 64, 64).astype(jnp.bfloat16)
        acc = acc + jnp.dot(blk, w3_ref[t], preferred_element_type=jnp.float32)
    a3 = acc + b3_ref[...]                                    # [bb*64, 128]
    o_ref[...] = a3

    # BN3 partial stats over valid (even row, even col) positions only.
    r = jax.lax.broadcasted_iota(jnp.int32, (bb * 64, 1), 0)
    valid = ((r & 9) == 0).astype(jnp.float32)                # row&8==0, row&1==0
    s = jnp.sum(a3 * valid, axis=0, keepdims=True)
    sq = jnp.sum(a3 * a3 * valid, axis=0, keepdims=True)
    st_ref[...] = jnp.concatenate([s, sq], axis=0)[None]


# ----------------------------------------------------------------------------
# Kernel 3 (tiny, whole batch): BN3 normalize + LeakyReLU, conv4 as a VPU
# reduction (stride-2 subsample folded into zeroed weight rows) + sigmoid.
# ----------------------------------------------------------------------------
def _head_kernel(a3_ref, sc3_ref, sh3_ref, w4_ref, b4_ref, o_ref):
    B = a3_ref.shape[0] // 64
    y = a3_ref[...] * sc3_ref[...] + sh3_ref[...]             # BN3 affine
    y = jnp.where(y > 0, y, 0.2 * y)                          # LeakyReLU(0.2)
    y = y.reshape(B, 64, 128)
    prod = y * w4_ref[...]                                    # [B,64,128]
    s = jnp.sum(prod, axis=1)                                 # sublane reduce
    s = jnp.sum(s, axis=1, keepdims=True)                     # one lane reduce
    z = s + b4_ref[...]
    e = jnp.exp(-jnp.abs(z))                                  # stable sigmoid
    o_ref[...] = jnp.where(z >= 0, 1.0 / (1.0 + e), e / (1.0 + e))


# ----------------------------------------------------------------------------
# Parameter init (PyTorch default conv init) + one-time weight repacking.
# ----------------------------------------------------------------------------
def init_params(key):
    ks = jax.random.split(key, 4)

    def conv_init(k, cout, cin, kh, kw):
        fan_in = cin * kh * kw
        bound = 1.0 / float(np.sqrt(fan_in))
        kw_, kb_ = jax.random.split(k)
        w = jax.random.uniform(kw_, (cout, cin, kh, kw), jnp.float32, -bound, bound)
        b = jax.random.uniform(kb_, (cout,), jnp.float32, -bound, bound)
        return w, b

    p = {}
    p["w1"], p["b1"] = conv_init(ks[0], 32, 1, 4, 4)
    p["w2"], p["b2"] = conv_init(ks[1], 64, 32, 4, 4)
    p["g2"], p["be2"] = jnp.ones((64,), jnp.float32), jnp.zeros((64,), jnp.float32)
    p["w3"], p["b3"] = conv_init(ks[2], 128, 64, 3, 3)
    p["g3"], p["be3"] = jnp.ones((128,), jnp.float32), jnp.zeros((128,), jnp.float32)
    p["w4"], p["b4"] = conv_init(ks[3], 1, 128, 4, 4)
    return p


def pack_params(p):
    """Hoisted (run once): repack conv weights into the kernel matmul layouts."""
    # conv1: [K=64, N=128]; K=(dR,dC,u,v) over the s2d-4 window, N=(pr,pc,cout).
    w1 = np.asarray(jax.device_get(p["w1"]), np.float32)        # [32,1,4,4]
    w1big = np.zeros((64, 128), np.float32)
    for dr in range(2):
        for dc in range(2):
            for u in range(4):
                for v in range(4):
                    k = (dr * 2 + dc) * 16 + u * 4 + v
                    for pr in range(2):
                        for pc in range(2):
                            i = 4 * dr + u - 2 * pr
                            j = 4 * dc + v - 2 * pc
                            if 0 <= i < 4 and 0 <= j < 4:
                                n0 = (pr * 2 + pc) * 32
                                w1big[k, n0:n0 + 32] = w1[:, 0, i, j]
    b1big = np.tile(np.asarray(jax.device_get(p["b1"]), np.float32), 4)

    # conv2: 9 zero-padded [128, 64] blocks, one per spatial offset (r0, c0);
    # block row = (pr*2+pc)*32 + cin, tap (i,j) = (2*r0+pr-1, 2*c0+pc-1).
    w2 = np.asarray(jax.device_get(p["w2"]), np.float32)        # [64,32,4,4]
    w2blk = np.zeros((9, 128, 64), np.float32)
    for r0 in range(3):
        for c0 in range(3):
            for pr in range(2):
                i = 2 * r0 + pr - 1
                if not 0 <= i < 4:
                    continue
                for pc in range(2):
                    j = 2 * c0 + pc - 1
                    if not 0 <= j < 4:
                        continue
                    base = (pr * 2 + pc) * 32
                    w2blk[r0 * 3 + c0, base:base + 32, :] = w2[:, :, i, j].T

    # conv3 (stride-1 form): 9 per-tap [64, 128] blocks.
    w3 = np.asarray(jax.device_get(p["w3"]), np.float32)        # [128,64,3,3]
    w3blk = np.zeros((9, 64, 128), np.float32)
    for i in range(3):
        for j in range(3):
            w3blk[i * 3 + j] = w3[:, :, i, j].T

    # conv4: [64, 128] with w4 placed at the 16 valid (even,even) stride-2
    # positions of the stride-1 conv3 grid and zeros elsewhere.
    w4 = np.asarray(jax.device_get(p["w4"]), np.float32)        # [1,128,4,4]
    w4m = np.zeros((64, 128), np.float32)
    for h3 in range(4):
        for w3i in range(4):
            w4m[(2 * h3) * 8 + (2 * w3i), :] = w4[0, :, h3, w3i]

    return {
        "w1": jnp.asarray(w1big, jnp.bfloat16),
        "b1": jnp.asarray(b1big.reshape(1, 128), jnp.float32),
        "w2": jnp.asarray(w2blk, jnp.bfloat16),
        "b2": p["b2"].reshape(1, 64),
        "g2": p["g2"], "be2": p["be2"],
        "w3": jnp.asarray(w3blk, jnp.bfloat16),
        "b3": p["b3"].reshape(1, 128),
        "g3": p["g3"], "be3": p["be3"],
        "w4m": jnp.asarray(w4m, jnp.float32),
        "b4": p["b4"].reshape(1, 1),
    }


# ----------------------------------------------------------------------------
# Forward pass: 3 pallas_calls + a few scalar-sized XLA ops for the BN affines.
# ----------------------------------------------------------------------------
def discriminator_forward(x_nchw, pk):
    B = x_nchw.shape[0]
    x2 = x_nchw.reshape(B, 32, 32).astype(jnp.float32)          # Cin == 1

    # XLA prep (bytes-trivial): conv pad=1 (+ zeros to a multiple of 4),
    # space-to-depth(4), and the 4-way shifted-window lane concat, so kernel 1
    # receives lane-dense conv1 windows and does no relayout work.
    xp = jnp.pad(x2, ((0, 0), (1, 3), (1, 3)))                  # [B,36,36]
    xs = xp.reshape(B, 9, 4, 9, 4).transpose(0, 1, 3, 2, 4).reshape(B, 9, 9, 16)
    xwin = jnp.concatenate([xs[:, dr:dr + 8, dc:dc + 8, :]
                            for dr in (0, 1) for dc in (0, 1)], axis=-1)
    xwin = xwin.astype(jnp.bfloat16)                            # [B,8,8,64]

    bb = _pick_bb(B)
    nb = B // bb

    a2, st2 = pl.pallas_call(
        _conv12_kernel,
        out_shape=(jax.ShapeDtypeStruct((B * 32, 128), jnp.float32),
                   jax.ShapeDtypeStruct((nb, 2, 128), jnp.float32)),
        grid_spec=pltpu.PrefetchScalarGridSpec(
            num_scalar_prefetch=0, grid=(nb,),
            in_specs=[
                pl.BlockSpec((bb, 8, 8, 64), lambda i: (i, 0, 0, 0)),
                pl.BlockSpec((64, 128), lambda i: (0, 0)),
                pl.BlockSpec((1, 128), lambda i: (0, 0)),
                pl.BlockSpec((9, 128, 64), lambda i: (0, 0, 0)),
                pl.BlockSpec((1, 64), lambda i: (0, 0)),
            ],
            out_specs=[
                pl.BlockSpec((bb * 32, 128), lambda i: (i, 0)),
                pl.BlockSpec((1, 2, 128), lambda i: (i, 0, 0)),
            ]),
        compiler_params=pltpu.CompilerParams(
            dimension_semantics=("parallel",)),
        cost_estimate=pl.CostEstimate(
            flops=int(2 * B * 64 * 128 * (64 + 9 * 64)),
            transcendentals=0,
            bytes_accessed=int(B * 8 * 8 * 64 * 2
                               + (64 * 128 + 9 * 128 * 64) * 2
                               + B * 32 * 128 * 4)),
    )(xwin, pk["w1"], pk["b1"], pk["w2"], pk["b2"])

    # BN2 batch statistics: fold per-tile partial sums and the two 64-lane
    # halves of the packed layout onto the 64 channels, build the affine.
    tot2 = jnp.sum(st2, axis=0)                                 # [2,128]
    cnt2 = float(B * 64)
    mean2 = (tot2[0, :64] + tot2[0, 64:]) / cnt2
    var2 = jnp.maximum((tot2[1, :64] + tot2[1, 64:]) / cnt2 - mean2 * mean2, 0.0)
    inv2 = jax.lax.rsqrt(var2 + 1e-5)
    sc2 = (pk["g2"] * inv2).reshape(1, 64)
    sh2 = (pk["be2"] - pk["g2"] * mean2 * inv2).reshape(1, 64)

    a3, st3 = pl.pallas_call(
        _conv3_kernel,
        out_shape=(jax.ShapeDtypeStruct((B * 64, 128), jnp.float32),
                   jax.ShapeDtypeStruct((nb, 2, 128), jnp.float32)),
        grid_spec=pltpu.PrefetchScalarGridSpec(
            num_scalar_prefetch=0, grid=(nb,),
            in_specs=[
                pl.BlockSpec((bb * 32, 128), lambda i: (i, 0)),
                pl.BlockSpec((1, 64), lambda i: (0, 0)),
                pl.BlockSpec((1, 64), lambda i: (0, 0)),
                pl.BlockSpec((9, 64, 128), lambda i: (0, 0, 0)),
                pl.BlockSpec((1, 128), lambda i: (0, 0)),
            ],
            out_specs=[
                pl.BlockSpec((bb * 64, 128), lambda i: (i, 0)),
                pl.BlockSpec((1, 2, 128), lambda i: (i, 0, 0)),
            ]),
        compiler_params=pltpu.CompilerParams(
            dimension_semantics=("parallel",)),
        cost_estimate=pl.CostEstimate(
            flops=int(2 * B * 9 * 64 * 64 * 128),
            transcendentals=0,
            bytes_accessed=int(B * 32 * 128 * 4 + 9 * 64 * 128 * 2
                               + B * 64 * 128 * 4)),
    )(a2, sc2, sh2, pk["w3"], pk["b3"])

    # BN3 batch statistics (kernel 2 masked the sums to the 16 valid
    # stride-2 positions per sample).
    tot3 = jnp.sum(st3, axis=0)                                 # [2,128]
    cnt3 = float(B * 16)
    mean3 = tot3[0] / cnt3
    var3 = jnp.maximum(tot3[1] / cnt3 - mean3 * mean3, 0.0)
    inv3 = jax.lax.rsqrt(var3 + 1e-5)
    sc3 = (pk["g3"] * inv3).reshape(1, 128)
    sh3 = (pk["be3"] - pk["g3"] * mean3 * inv3).reshape(1, 128)

    out = pl.pallas_call(
        _head_kernel,
        out_shape=jax.ShapeDtypeStruct((B, 1), jnp.float32),
        in_specs=[_VMEM] * 5,
        out_specs=_VMEM,
        compiler_params=pltpu.CompilerParams(
            vmem_limit_bytes=32 * 1024 * 1024),
        cost_estimate=pl.CostEstimate(
            flops=int(4 * B * 64 * 128),
            transcendentals=int(B),
            bytes_accessed=int(B * 64 * 128 * 4 + 64 * 128 * 4 + B * 4)),
    )(a3, sc3, sh3, pk["w4m"], pk["b4"])

    # output.view(-1, 1).squeeze(1) -> shape [B]
    return out.reshape(-1)


# ----------------------------------------------------------------------------
# Pure-JAX reference (same training-mode semantics) for a correctness check.
# ----------------------------------------------------------------------------
def _reference_forward(x, p):
    def conv(x, w, b, stride, pad):
        y = jax.lax.conv_general_dilated(
            x, w, window_strides=(stride, stride),
            padding=[(pad, pad), (pad, pad)],
            dimension_numbers=("NCHW", "OIHW", "NCHW"))
        return y + b[None, :, None, None]

    def bn(x, g, be):
        m = jnp.mean(x, axis=(0, 2, 3), keepdims=True)
        v = jnp.mean((x - m) ** 2, axis=(0, 2, 3), keepdims=True)
        return g[None, :, None, None] * (x - m) / jnp.sqrt(v + 1e-5) \
            + be[None, :, None, None]

    lrelu = lambda t: jnp.where(t > 0, t, 0.2 * t)
    y = lrelu(conv(x, p["w1"], p["b1"], 2, 1))
    y = lrelu(bn(conv(y, p["w2"], p["b2"], 2, 1), p["g2"], p["be2"]))
    y = lrelu(bn(conv(y, p["w3"], p["b3"], 2, 1), p["g3"], p["be3"]))
    y = conv(y, p["w4"], p["b4"], 1, 0)
    return jax.nn.sigmoid(y).reshape(-1)


if __name__ == "__main__":
    key = jax.random.PRNGKey(0)
    k_x, k_p = jax.random.split(key)

    x = jax.random.normal(k_x, (2, 1, 32, 32), jnp.float32)
    params = init_params(k_p)
    packed = pack_params(params)          # hoisted: packed once, reused

    fwd = jax.jit(discriminator_forward)
    out = jax.block_until_ready(fwd(x, packed))

    ref = jax.block_until_ready(jax.jit(_reference_forward)(x, params))

    assert out.shape == (2,)
    assert bool(jnp.all(jnp.isfinite(out)))
    assert bool(jnp.all((out >= 0.0) & (out <= 1.0)))
    assert float(jnp.max(jnp.abs(out - ref))) < 3e-2, (out, ref)
    print("KERNEL_OK")
</pallas_src>

<mosaic_0001>
module attributes {stable_mosaic.version = 11 : i64} {
  func.func @_conv12_kernel(%arg0: i32, %arg1: memref<1x8x8x64xbf16, #tpu.memory_space<vmem>>, %arg2: memref<64x128xbf16, #tpu.memory_space<vmem>>, %arg3: memref<1x128xf32, #tpu.memory_space<vmem>>, %arg4: memref<9x128x64xbf16, #tpu.memory_space<vmem>>, %arg5: memref<1x64xf32, #tpu.memory_space<vmem>>, %arg6: memref<32x128xf32, #tpu.memory_space<vmem>>, %arg7: memref<1x2x128xf32, #tpu.memory_space<vmem>>) attributes {dimension_semantics = [#tpu.dimension_semantics<parallel>], iteration_bounds = array<i64: 2>, scalar_prefetch = 0 : i64, scratch_operands = 0 : i64, tpu.core_type = #tpu.core_type<tc>, window_params = [{transform_indices = @transform_0, window_bounds = array<i64: 1, 8, 8, 64>}, {pipeline_mode = #tpu.pipeline_mode<synchronous>, transform_indices = @transform_1, window_bounds = array<i64: 64, 128>}, {pipeline_mode = #tpu.pipeline_mode<synchronous>, transform_indices = @transform_2, window_bounds = array<i64: 1, 128>}, {pipeline_mode = #tpu.pipeline_mode<synchronous>, transform_indices = @transform_3, window_bounds = array<i64: 9, 128, 64>}, {pipeline_mode = #tpu.pipeline_mode<synchronous>, transform_indices = @transform_4, window_bounds = array<i64: 1, 64>}, {transform_indices = @transform_5, window_bounds = array<i64: 32, 128>}, {transform_indices = @transform_6, window_bounds = array<i64: 1, 2, 128>}]} {
    %c0 = arith.constant 0 : index
    %c0_0 = arith.constant 0 : index
    %c0_1 = arith.constant 0 : index
    %c0_2 = arith.constant 0 : index
    %0 = vector.load %arg1[%c0, %c0_0, %c0_1, %c0_2] : memref<1x8x8x64xbf16, #tpu.memory_space<vmem>>, vector<1x8x8x64xbf16>
    %1 = vector.shape_cast %0 : vector<1x8x8x64xbf16> to vector<64x64xbf16>
    %c0_3 = arith.constant 0 : index
    %c0_4 = arith.constant 0 : index
    %2 = vector.load %arg2[%c0_3, %c0_4] : memref<64x128xbf16, #tpu.memory_space<vmem>>, vector<64x128xbf16>
    %cst = arith.constant dense<0.000000e+00> : vector<64x128xf32>
    %3 = tpu.matmul %1, %2, %cst {dimension_numbers = #tpu.dot_dimension_numbers<[1], [0], [0], [1], [0, 0, 1, 1], [], []>} : vector<64x64xbf16>, vector<64x128xbf16>, vector<64x128xf32> -> vector<64x128xf32>
    %c0_5 = arith.constant 0 : index
    %c0_6 = arith.constant 0 : index
    %4 = vector.load %arg3[%c0_5, %c0_6] : memref<1x128xf32, #tpu.memory_space<vmem>>, vector<1x128xf32>
    %5 = vector.broadcast %4 : vector<1x128xf32> to vector<64x128xf32>
    %6 = arith.addf %3, %5 : vector<64x128xf32>
    %cst_7 = arith.constant 0.000000e+00 : f32
    %7 = vector.broadcast %cst_7 : f32 to vector<64x128xf32>
    %8 = arith.cmpf ogt, %6, %7 : vector<64x128xf32>
    %cst_8 = arith.constant 2.000000e-01 : f32
    %9 = vector.broadcast %cst_8 : f32 to vector<64x128xf32>
    %10 = arith.mulf %9, %6 : vector<64x128xf32>
    %11 = arith.select %8, %6, %10 : vector<64x128xi1>, vector<64x128xf32>
    %12 = vector.shape_cast %11 : vector<64x128xf32> to vector<1x8x8x128xf32>
    %cst_9 = arith.constant 0.000000e+00 : f32
    %13 = vector.broadcast %cst_9 : f32 to vector<1x1x8x128xf32>
    %14 = tpu.concatenate %13, %12, %13 in 1 : vector<1x1x8x128xf32>, vector<1x8x8x128xf32>, vector<1x1x8x128xf32> -> vector<1x10x8x128xf32>
    %cst_10 = arith.constant 0.000000e+00 : f32
    %15 = vector.broadcast %cst_10 : f32 to vector<1x10x1x128xf32>
    %16 = tpu.concatenate %15, %14, %15 in 2 : vector<1x10x1x128xf32>, vector<1x10x8x128xf32>, vector<1x10x1x128xf32> -> vector<1x10x10x128xf32>
    %cst_11 = arith.constant 0.000000e+00 : f32
    %17 = vector.broadcast %cst_11 : f32 to vector<64x64xf32>
    %18 = vector.extract_strided_slice %16 {offsets = [0, 0, 0, 0], sizes = [1, 8, 8, 128], strides = [1, 1, 1, 1]} : vector<1x10x10x128xf32> to vector<1x8x8x128xf32>
    %19 = vector.shape_cast %18 : vector<1x8x8x128xf32> to vector<64x128xf32>
    %20 = arith.truncf %19 : vector<64x128xf32> to vector<64x128xbf16>
    %c0_12 = arith.constant 0 : index
    %c0_13 = arith.constant 0 : index
    %c0_14 = arith.constant 0 : index
    %21 = vector.load %arg4[%c0_12, %c0_13, %c0_14] : memref<9x128x64xbf16, #tpu.memory_space<vmem>>, vector<1x128x64xbf16>
    %22 = vector.shape_cast %21 : vector<1x128x64xbf16> to vector<128x64xbf16>
    %cst_15 = arith.constant dense<0.000000e+00> : vector<64x64xf32>
    %23 = tpu.matmul %20, %22, %cst_15 {dimension_numbers = #tpu.dot_dimension_numbers<[1], [0], [0], [1], [0, 0, 1, 1], [], []>} : vector<64x128xbf16>, vector<128x64xbf16>, vector<64x64xf32> -> vector<64x64xf32>
    %24 = arith.addf %17, %23 : vector<64x64xf32>
    %25 = vector.extract_strided_slice %16 {offsets = [0, 0, 1, 0], sizes = [1, 8, 8, 128], strides = [1, 1, 1, 1]} : vector<1x10x10x128xf32> to vector<1x8x8x128xf32>
    %26 = vector.shape_cast %25 : vector<1x8x8x128xf32> to vector<64x128xf32>
    %27 = arith.truncf %26 : vector<64x128xf32> to vector<64x128xbf16>
    %c1 = arith.constant 1 : index
    %c0_16 = arith.constant 0 : index
    %c0_17 = arith.constant 0 : index
    %28 = vector.load %arg4[%c1, %c0_16, %c0_17] : memref<9x128x64xbf16, #tpu.memory_space<vmem>>, vector<1x128x64xbf16>
    %29 = vector.shape_cast %28 : vector<1x128x64xbf16> to vector<128x64xbf16>
    %cst_18 = arith.constant dense<0.000000e+00> : vector<64x64xf32>
    %30 = tpu.matmul %27, %29, %cst_18 {dimension_numbers = #tpu.dot_dimension_numbers<[1], [0], [0], [1], [0, 0, 1, 1], [], []>} : vector<64x128xbf16>, vector<128x64xbf16>, vector<64x64xf32> -> vector<64x64xf32>
    %31 = arith.addf %24, %30 : vector<64x64xf32>
    %32 = vector.extract_strided_slice %16 {offsets = [0, 0, 2, 0], sizes = [1, 8, 8, 128], strides = [1, 1, 1, 1]} : vector<1x10x10x128xf32> to vector<1x8x8x128xf32>
    %33 = vector.shape_cast %32 : vector<1x8x8x128xf32> to vector<64x128xf32>
    %34 = arith.truncf %33 : vector<64x128xf32> to vector<64x128xbf16>
    %c2 = arith.constant 2 : index
    %c0_19 = arith.constant 0 : index
    %c0_20 = arith.constant 0 : index
    %35 = vector.load %arg4[%c2, %c0_19, %c0_20] : memref<9x128x64xbf16, #tpu.memory_space<vmem>>, vector<1x128x64xbf16>
    %36 = vector.shape_cast %35 : vector<1x128x64xbf16> to vector<128x64xbf16>
    %cst_21 = arith.constant dense<0.000000e+00> : vector<64x64xf32>
    %37 = tpu.matmul %34, %36, %cst_21 {dimension_numbers = #tpu.dot_dimension_numbers<[1], [0], [0], [1], [0, 0, 1, 1], [], []>} : vector<64x128xbf16>, vector<128x64xbf16>, vector<64x64xf32> -> vector<64x64xf32>
    %38 = arith.addf %31, %37 : vector<64x64xf32>
    %39 = vector.extract_strided_slice %16 {offsets = [0, 1, 0, 0], sizes = [1, 8, 8, 128], strides = [1, 1, 1, 1]} : vector<1x10x10x128xf32> to vector<1x8x8x128xf32>
    %40 = vector.shape_cast %39 : vector<1x8x8x128xf32> to vector<64x128xf32>
    %41 = arith.truncf %40 : vector<64x128xf32> to vector<64x128xbf16>
    %c3 = arith.constant 3 : index
    %c0_22 = arith.constant 0 : index
    %c0_23 = arith.constant 0 : index
    %42 = vector.load %arg4[%c3, %c0_22, %c0_23] : memref<9x128x64xbf16, #tpu.memory_space<vmem>>, vector<1x128x64xbf16>
    %43 = vector.shape_cast %42 : vector<1x128x64xbf16> to vector<128x64xbf16>
    %cst_24 = arith.constant dense<0.000000e+00> : vector<64x64xf32>
    %44 = tpu.matmul %41, %43, %cst_24 {dimension_numbers = #tpu.dot_dimension_numbers<[1], [0], [0], [1], [0, 0, 1, 1], [], []>} : vector<64x128xbf16>, vector<128x64xbf16>, vector<64x64xf32> -> vector<64x64xf32>
    %45 = arith.addf %38, %44 : vector<64x64xf32>
    %46 = vector.extract_strided_slice %16 {offsets = [0, 1, 1, 0], sizes = [1, 8, 8, 128], strides = [1, 1, 1, 1]} : vector<1x10x10x128xf32> to vector<1x8x8x128xf32>
    %47 = vector.shape_cast %46 : vector<1x8x8x128xf32> to vector<64x128xf32>
    %48 = arith.truncf %47 : vector<64x128xf32> to vector<64x128xbf16>
    %c4 = arith.constant 4 : index
    %c0_25 = arith.constant 0 : index
    %c0_26 = arith.constant 0 : index
    %49 = vector.load %arg4[%c4, %c0_25, %c0_26] : memref<9x128x64xbf16, #tpu.memory_space<vmem>>, vector<1x128x64xbf16>
    %50 = vector.shape_cast %49 : vector<1x128x64xbf16> to vector<128x64xbf16>
    %cst_27 = arith.constant dense<0.000000e+00> : vector<64x64xf32>
    %51 = tpu.matmul %48, %50, %cst_27 {dimension_numbers = #tpu.dot_dimension_numbers<[1], [0], [0], [1], [0, 0, 1, 1], [], []>} : vector<64x128xbf16>, vector<128x64xbf16>, vector<64x64xf32> -> vector<64x64xf32>
    %52 = arith.addf %45, %51 : vector<64x64xf32>
    %53 = vector.extract_strided_slice %16 {offsets = [0, 1, 2, 0], sizes = [1, 8, 8, 128], strides = [1, 1, 1, 1]} : vector<1x10x10x128xf32> to vector<1x8x8x128xf32>
    %54 = vector.shape_cast %53 : vector<1x8x8x128xf32> to vector<64x128xf32>
    %55 = arith.truncf %54 : vector<64x128xf32> to vector<64x128xbf16>
    %c5 = arith.constant 5 : index
    %c0_28 = arith.constant 0 : index
    %c0_29 = arith.constant 0 : index
    %56 = vector.load %arg4[%c5, %c0_28, %c0_29] : memref<9x128x64xbf16, #tpu.memory_space<vmem>>, vector<1x128x64xbf16>
    %57 = vector.shape_cast %56 : vector<1x128x64xbf16> to vector<128x64xbf16>
    %cst_30 = arith.constant dense<0.000000e+00> : vector<64x64xf32>
    %58 = tpu.matmul %55, %57, %cst_30 {dimension_numbers = #tpu.dot_dimension_numbers<[1], [0], [0], [1], [0, 0, 1, 1], [], []>} : vector<64x128xbf16>, vector<128x64xbf16>, vector<64x64xf32> -> vector<64x64xf32>
    %59 = arith.addf %52, %58 : vector<64x64xf32>
    %60 = vector.extract_strided_slice %16 {offsets = [0, 2, 0, 0], sizes = [1, 8, 8, 128], strides = [1, 1, 1, 1]} : vector<1x10x10x128xf32> to vector<1x8x8x128xf32>
    %61 = vector.shape_cast %60 : vector<1x8x8x128xf32> to vector<64x128xf32>
    %62 = arith.truncf %61 : vector<64x128xf32> to vector<64x128xbf16>
    %c6 = arith.constant 6 : index
    %c0_31 = arith.constant 0 : index
    %c0_32 = arith.constant 0 : index
    %63 = vector.load %arg4[%c6, %c0_31, %c0_32] : memref<9x128x64xbf16, #tpu.memory_space<vmem>>, vector<1x128x64xbf16>
    %64 = vector.shape_cast %63 : vector<1x128x64xbf16> to vector<128x64xbf16>
    %cst_33 = arith.constant dense<0.000000e+00> : vector<64x64xf32>
    %65 = tpu.matmul %62, %64, %cst_33 {dimension_numbers = #tpu.dot_dimension_numbers<[1], [0], [0], [1], [0, 0, 1, 1], [], []>} : vector<64x128xbf16>, vector<128x64xbf16>, vector<64x64xf32> -> vector<64x64xf32>
    %66 = arith.addf %59, %65 : vector<64x64xf32>
    %67 = vector.extract_strided_slice %16 {offsets = [0, 2, 1, 0], sizes = [1, 8, 8, 128], strides = [1, 1, 1, 1]} : vector<1x10x10x128xf32> to vector<1x8x8x128xf32>
    %68 = vector.shape_cast %67 : vector<1x8x8x128xf32> to vector<64x128xf32>
    %69 = arith.truncf %68 : vector<64x128xf32> to vector<64x128xbf16>
    %c7 = arith.constant 7 : index
    %c0_34 = arith.constant 0 : index
    %c0_35 = arith.constant 0 : index
    %70 = vector.load %arg4[%c7, %c0_34, %c0_35] : memref<9x128x64xbf16, #tpu.memory_space<vmem>>, vector<1x128x64xbf16>
    %71 = vector.shape_cast %70 : vector<1x128x64xbf16> to vector<128x64xbf16>
    %cst_36 = arith.constant dense<0.000000e+00> : vector<64x64xf32>
    %72 = tpu.matmul %69, %71, %cst_36 {dimension_numbers = #tpu.dot_dimension_numbers<[1], [0], [0], [1], [0, 0, 1, 1], [], []>} : vector<64x128xbf16>, vector<128x64xbf16>, vector<64x64xf32> -> vector<64x64xf32>
    %73 = arith.addf %66, %72 : vector<64x64xf32>
    %74 = vector.extract_strided_slice %16 {offsets = [0, 2, 2, 0], sizes = [1, 8, 8, 128], strides = [1, 1, 1, 1]} : vector<1x10x10x128xf32> to vector<1x8x8x128xf32>
    %75 = vector.shape_cast %74 : vector<1x8x8x128xf32> to vector<64x128xf32>
    %76 = arith.truncf %75 : vector<64x128xf32> to vector<64x128xbf16>
    %c8 = arith.constant 8 : index
    %c0_37 = arith.constant 0 : index
    %c0_38 = arith.constant 0 : index
    %77 = vector.load %arg4[%c8, %c0_37, %c0_38] : memref<9x128x64xbf16, #tpu.memory_space<vmem>>, vector<1x128x64xbf16>
    %78 = vector.shape_cast %77 : vector<1x128x64xbf16> to vector<128x64xbf16>
    %cst_39 = arith.constant dense<0.000000e+00> : vector<64x64xf32>
    %79 = tpu.matmul %76, %78, %cst_39 {dimension_numbers = #tpu.dot_dimension_numbers<[1], [0], [0], [1], [0, 0, 1, 1], [], []>} : vector<64x128xbf16>, vector<128x64xbf16>, vector<64x64xf32> -> vector<64x64xf32>
    %80 = arith.addf %73, %79 : vector<64x64xf32>
    %c0_40 = arith.constant 0 : index
    %c0_41 = arith.constant 0 : index
    %81 = vector.load %arg5[%c0_40, %c0_41] : memref<1x64xf32, #tpu.memory_space<vmem>>, vector<1x64xf32>
    %82 = vector.broadcast %81 : vector<1x64xf32> to vector<64x64xf32>
    %83 = arith.addf %80, %82 : vector<64x64xf32>
    %84 = vector.shape_cast %83 : vector<64x64xf32> to vector<1x8x8x64xf32>
    %85 = vector.extract_strided_slice %84 {offsets = [0, 0, 0, 0], sizes = [1, 4, 8, 64], strides = [1, 1, 1, 1]} : vector<1x8x8x64xf32> to vector<1x4x8x64xf32>
    %86 = vector.extract_strided_slice %84 {offsets = [0, 4, 0, 0], sizes = [1, 4, 8, 64], strides = [1, 1, 1, 1]} : vector<1x8x8x64xf32> to vector<1x4x8x64xf32>
    %87 = tpu.concatenate %85, %86 in 3 : vector<1x4x8x64xf32>, vector<1x4x8x64xf32> -> vector<1x4x8x128xf32>
    %88 = vector.shape_cast %87 : vector<1x4x8x128xf32> to vector<32x128xf32>
    %c0_42 = arith.constant 0 : index
    %c0_43 = arith.constant 0 : index
    %89 = vector.load %arg6[%c0_42, %c0_43] : memref<32x128xf32, #tpu.memory_space<vmem>>, vector<32x128xf32>
    tpu.vector_store %arg6[%c0_42, %c0_43], %88 {strides = array<i32>} : memref<32x128xf32, #tpu.memory_space<vmem>>, vector<32x128xf32>,
    %cst_44 = arith.constant dense<0.000000e+00> : vector<128xf32>
    %90 = vector.multi_reduction <add>, %88, %cst_44 [0] : vector<32x128xf32> to vector<128xf32>
    %91 = vector.shape_cast %90 : vector<128xf32> to vector<1x128xf32>
    %92 = arith.mulf %88, %88 : vector<32x128xf32>
    %cst_45 = arith.constant dense<0.000000e+00> : vector<128xf32>
    %93 = vector.multi_reduction <add>, %92, %cst_45 [0] : vector<32x128xf32> to vector<128xf32>
    %94 = vector.shape_cast %93 : vector<128xf32> to vector<1x128xf32>
    %95 = tpu.concatenate %91, %94 in 0 : vector<1x128xf32>, vector<1x128xf32> -> vector<2x128xf32>
    %96 = vector.shape_cast %95 : vector<2x128xf32> to vector<1x2x128xf32>
    %c0_46 = arith.constant 0 : index
    %c0_47 = arith.constant 0 : index
    %c0_48 = arith.constant 0 : index
    %97 = vector.load %arg7[%c0_46, %c0_47, %c0_48] : memref<1x2x128xf32, #tpu.memory_space<vmem>>, vector<1x2x128xf32>
    tpu.vector_store %arg7[%c0_46, %c0_47, %c0_48], %96 {strides = array<i32>} : memref<1x2x128xf32, #tpu.memory_space<vmem>>, vector<1x2x128xf32>,
    return
  }
  func.func @transform_0(%arg0: i32) -> (i32, i32, i32, i32) {
    %c0_i32 = arith.constant 0 : i32
    %c0_i32_0 = arith.constant 0 : i32
    %c0_i32_1 = arith.constant 0 : i32
    %c0_i32_2 = arith.constant 0 : i32
    return %arg0, %c0_i32, %c0_i32_0, %c0_i32_1 : i32, i32, i32, i32
  }
  func.func @transform_1(%arg0: i32) -> (i32, i32) {
    %c0_i32 = arith.constant 0 : i32
    %c0_i32_0 = arith.constant 0 : i32
    %c0_i32_1 = arith.constant 0 : i32
    return %c0_i32, %c0_i32_0 : i32, i32
  }
  func.func @transform_2(%arg0: i32) -> (i32, i32) {
    %c0_i32 = arith.constant 0 : i32
    %c0_i32_0 = arith.constant 0 : i32
    %c0_i32_1 = arith.constant 0 : i32
    return %c0_i32, %c0_i32_0 : i32, i32
  }
  func.func @transform_3(%arg0: i32) -> (i32, i32, i32) {
    %c0_i32 = arith.constant 0 : i32
    %c0_i32_0 = arith.constant 0 : i32
    %c0_i32_1 = arith.constant 0 : i32
    %c0_i32_2 = arith.constant 0 : i32
    return %c0_i32, %c0_i32_0, %c0_i32_1 : i32, i32, i32
  }
  func.func @transform_4(%arg0: i32) -> (i32, i32) {
    %c0_i32 = arith.constant 0 : i32
    %c0_i32_0 = arith.constant 0 : i32
    %c0_i32_1 = arith.constant 0 : i32
    return %c0_i32, %c0_i32_0 : i32, i32
  }
  func.func @transform_5(%arg0: i32) -> (i32, i32) {
    %c0_i32 = arith.constant 0 : i32
    %c0_i32_0 = arith.constant 0 : i32
    return %arg0, %c0_i32 : i32, i32
  }
  func.func @transform_6(%arg0: i32) -> (i32, i32, i32) {
    %c0_i32 = arith.constant 0 : i32
    %c0_i32_0 = arith.constant 0 : i32
    %c0_i32_1 = arith.constant 0 : i32
    return %arg0, %c0_i32, %c0_i32_0 : i32, i32, i32
  }
}

module attributes {stable_mosaic.version = 11 : i64} {
  func.func @_head_kernel(%arg0: memref<128x128xf32, #tpu.memory_space<vmem>>, %arg1: memref<1x128xf32, #tpu.memory_space<vmem>>, %arg2: memref<1x128xf32, #tpu.memory_space<vmem>>, %arg3: memref<64x128xf32, #tpu.memory_space<vmem>>, %arg4: memref<1x1xf32, #tpu.memory_space<vmem>>, %arg5: memref<2x1xf32, #tpu.memory_space<vmem>>) attributes {dimension_semantics = [], scalar_prefetch = 0 : i64, scratch_operands = 0 : i64, tpu.core_type = #tpu.core_type<tc>} {
    %c0 = arith.constant 0 : index
    %c0_0 = arith.constant 0 : index
    %0 = vector.load %arg0[%c0, %c0_0] : memref<128x128xf32, #tpu.memory_space<vmem>>, vector<128x128xf32>
    %c0_1 = arith.constant 0 : index
    %c0_2 = arith.constant 0 : index
    %1 = vector.load %arg1[%c0_1, %c0_2] : memref<1x128xf32, #tpu.memory_space<vmem>>, vector<1x128xf32>
    %2 = vector.broadcast %1 : vector<1x128xf32> to vector<128x128xf32>
    %3 = arith.mulf %0, %2 : vector<128x128xf32>
    %c0_3 = arith.constant 0 : index
    %c0_4 = arith.constant 0 : index
    %4 = vector.load %arg2[%c0_3, %c0_4] : memref<1x128xf32, #tpu.memory_space<vmem>>, vector<1x128xf32>
    %5 = vector.broadcast %4 : vector<1x128xf32> to vector<128x128xf32>
    %6 = arith.addf %3, %5 : vector<128x128xf32>
    %cst = arith.constant 0.000000e+00 : f32
    %7 = vector.broadcast %cst : f32 to vector<128x128xf32>
    %8 = arith.cmpf ogt, %6, %7 : vector<128x128xf32>
    %cst_5 = arith.constant 2.000000e-01 : f32
    %9 = vector.broadcast %cst_5 : f32 to vector<128x128xf32>
    %10 = arith.mulf %9, %6 : vector<128x128xf32>
    %11 = arith.select %8, %6, %10 : vector<128x128xi1>, vector<128x128xf32>
    %12 = vector.shape_cast %11 : vector<128x128xf32> to vector<2x64x128xf32>
    %c0_6 = arith.constant 0 : index
    %c0_7 = arith.constant 0 : index
    %13 = vector.load %arg3[%c0_6, %c0_7] : memref<64x128xf32, #tpu.memory_space<vmem>>, vector<64x128xf32>
    %14 = vector.shape_cast %13 : vector<64x128xf32> to vector<1x64x128xf32>
    %15 = vector.broadcast %14 : vector<1x64x128xf32> to vector<2x64x128xf32>
    %16 = arith.mulf %12, %15 : vector<2x64x128xf32>
    %cst_8 = arith.constant dense<0.000000e+00> : vector<2x128xf32>
    %17 = vector.multi_reduction <add>, %16, %cst_8 [1] : vector<2x64x128xf32> to vector<2x128xf32>
    %cst_9 = arith.constant dense<0.000000e+00> : vector<2xf32>
    %18 = vector.multi_reduction <add>, %17, %cst_9 [1] : vector<2x128xf32> to vector<2xf32>
    %19 = vector.shape_cast %18 : vector<2xf32> to vector<2x1xf32>
    %c0_10 = arith.constant 0 : index
    %c0_11 = arith.constant 0 : index
    %20 = vector.load %arg4[%c0_10, %c0_11] : memref<1x1xf32, #tpu.memory_space<vmem>>, vector<1x1xf32>
    %21 = vector.broadcast %20 : vector<1x1xf32> to vector<2x1xf32>
    %22 = arith.addf %19, %21 : vector<2x1xf32>
    %23 = math.absf %22 : vector<2x1xf32>
    %cst_12 = arith.constant 0.000000e+00 : f32
    %24 = vector.broadcast %cst_12 : f32 to vector<2x1xf32>
    %25 = arith.subf %24, %23 : vector<2x1xf32>
    %26 = math.exp %25 : vector<2x1xf32>
    %cst_13 = arith.constant 0.000000e+00 : f32
    %27 = vector.broadcast %cst_13 : f32 to vector<2x1xf32>
    %28 = arith.cmpf oge, %22, %27 : vector<2x1xf32>
    %cst_14 = arith.constant 1.000000e+00 : f32
    %29 = vector.broadcast %cst_14 : f32 to vector<2x1xf32>
    %30 = arith.addf %29, %26 : vector<2x1xf32>
    %cst_15 = arith.constant 1.000000e+00 : f32
    %31 = vector.broadcast %cst_15 : f32 to vector<2x1xf32>
    %32 = arith.divf %31, %30 : vector<2x1xf32>
    %cst_16 = arith.constant 1.000000e+00 : f32
    %33 = vector.broadcast %cst_16 : f32 to vector<2x1xf32>
    %34 = arith.addf %33, %26 : vector<2x1xf32>
    %35 = arith.divf %26, %34 : vector<2x1xf32>
    %36 = arith.select %28, %32, %35 : vector<2x1xi1>, vector<2x1xf32>
    %c0_17 = arith.constant 0 : index
    %c0_18 = arith.constant 0 : index
    %37 = vector.load %arg5[%c0_17, %c0_18] : memref<2x1xf32, #tpu.memory_space<vmem>>, vector<2x1xf32>
    tpu.vector_store %arg5[%c0_17, %c0_18], %36 {strides = array<i32>} : memref<2x1xf32, #tpu.memory_space<vmem>>, vector<2x1xf32>,
    return
  }
}

module attributes {stable_mosaic.version = 11 : i64} {
  func.func @_conv3_kernel(%arg0: i32, %arg1: memref<32x128xf32, #tpu.memory_space<vmem>>, %arg2: memref<1x64xf32, #tpu.memory_space<vmem>>, %arg3: memref<1x64xf32, #tpu.memory_space<vmem>>, %arg4: memref<9x64x128xbf16, #tpu.memory_space<vmem>>, %arg5: memref<1x128xf32, #tpu.memory_space<vmem>>, %arg6: memref<64x128xf32, #tpu.memory_space<vmem>>, %arg7: memref<1x2x128xf32, #tpu.memory_space<vmem>>) attributes {dimension_semantics = [#tpu.dimension_semantics<parallel>], iteration_bounds = array<i64: 2>, scalar_prefetch = 0 : i64, scratch_operands = 0 : i64, tpu.core_type = #tpu.core_type<tc>, window_params = [{transform_indices = @transform_0, window_bounds = array<i64: 32, 128>}, {pipeline_mode = #tpu.pipeline_mode<synchronous>, transform_indices = @transform_1, window_bounds = array<i64: 1, 64>}, {pipeline_mode = #tpu.pipeline_mode<synchronous>, transform_indices = @transform_2, window_bounds = array<i64: 1, 64>}, {pipeline_mode = #tpu.pipeline_mode<synchronous>, transform_indices = @transform_3, window_bounds = array<i64: 9, 64, 128>}, {pipeline_mode = #tpu.pipeline_mode<synchronous>, transform_indices = @transform_4, window_bounds = array<i64: 1, 128>}, {transform_indices = @transform_5, window_bounds = array<i64: 64, 128>}, {transform_indices = @transform_6, window_bounds = array<i64: 1, 2, 128>}]} {
    %c0 = arith.constant 0 : index
    %c0_0 = arith.constant 0 : index
    %0 = vector.load %arg1[%c0, %c0_0] : memref<32x128xf32, #tpu.memory_space<vmem>>, vector<32x128xf32>
    %1 = vector.shape_cast %0 : vector<32x128xf32> to vector<1x4x8x128xf32>
    %2 = vector.extract_strided_slice %1 {offsets = [0, 0, 0, 0], sizes = [1, 4, 8, 64], strides = [1, 1, 1, 1]} : vector<1x4x8x128xf32> to vector<1x4x8x64xf32>
    %3 = vector.extract_strided_slice %1 {offsets = [0, 0, 0, 64], sizes = [1, 4, 8, 64], strides = [1, 1, 1, 1]} : vector<1x4x8x128xf32> to vector<1x4x8x64xf32>
    %4 = tpu.concatenate %2, %3 in 1 : vector<1x4x8x64xf32>, vector<1x4x8x64xf32> -> vector<1x8x8x64xf32>
    %c0_1 = arith.constant 0 : index
    %c0_2 = arith.constant 0 : index
    %5 = vector.load %arg2[%c0_1, %c0_2] : memref<1x64xf32, #tpu.memory_space<vmem>>, vector<1x64xf32>
    %6 = vector.shape_cast %5 : vector<1x64xf32> to vector<1x1x1x64xf32>
    %7 = vector.broadcast %6 : vector<1x1x1x64xf32> to vector<1x8x8x64xf32>
    %8 = arith.mulf %4, %7 : vector<1x8x8x64xf32>
    %c0_3 = arith.constant 0 : index
    %c0_4 = arith.constant 0 : index
    %9 = vector.load %arg3[%c0_3, %c0_4] : memref<1x64xf32, #tpu.memory_space<vmem>>, vector<1x64xf32>
    %10 = vector.shape_cast %9 : vector<1x64xf32> to vector<1x1x1x64xf32>
    %11 = vector.broadcast %10 : vector<1x1x1x64xf32> to vector<1x8x8x64xf32>
    %12 = arith.addf %8, %11 : vector<1x8x8x64xf32>
    %cst = arith.constant 0.000000e+00 : f32
    %13 = vector.broadcast %cst : f32 to vector<1x8x8x64xf32>
    %14 = arith.cmpf ogt, %12, %13 : vector<1x8x8x64xf32>
    %cst_5 = arith.constant 2.000000e-01 : f32
    %15 = vector.broadcast %cst_5 : f32 to vector<1x8x8x64xf32>
    %16 = arith.mulf %15, %12 : vector<1x8x8x64xf32>
    %17 = arith.select %14, %12, %16 : vector<1x8x8x64xi1>, vector<1x8x8x64xf32>
    %cst_6 = arith.constant 0.000000e+00 : f32
    %18 = vector.broadcast %cst_6 : f32 to vector<1x1x8x64xf32>
    %19 = tpu.concatenate %18, %17, %18 in 1 : vector<1x1x8x64xf32>, vector<1x8x8x64xf32>, vector<1x1x8x64xf32> -> vector<1x10x8x64xf32>
    %cst_7 = arith.constant 0.000000e+00 : f32
    %20 = vector.broadcast %cst_7 : f32 to vector<1x10x1x64xf32>
    %21 = tpu.concatenate %20, %19, %20 in 2 : vector<1x10x1x64xf32>, vector<1x10x8x64xf32>, vector<1x10x1x64xf32> -> vector<1x10x10x64xf32>
    %cst_8 = arith.constant 0.000000e+00 : f32
    %22 = vector.broadcast %cst_8 : f32 to vector<64x128xf32>
    %23 = vector.extract_strided_slice %21 {offsets = [0, 0, 0, 0], sizes = [1, 8, 8, 64], strides = [1, 1, 1, 1]} : vector<1x10x10x64xf32> to vector<1x8x8x64xf32>
    %24 = vector.shape_cast %23 : vector<1x8x8x64xf32> to vector<64x64xf32>
    %25 = arith.truncf %24 : vector<64x64xf32> to vector<64x64xbf16>
    %c0_9 = arith.constant 0 : index
    %c0_10 = arith.constant 0 : index
    %c0_11 = arith.constant 0 : index
    %26 = vector.load %arg4[%c0_9, %c0_10, %c0_11] : memref<9x64x128xbf16, #tpu.memory_space<vmem>>, vector<1x64x128xbf16>
    %27 = vector.shape_cast %26 : vector<1x64x128xbf16> to vector<64x128xbf16>
    %cst_12 = arith.constant dense<0.000000e+00> : vector<64x128xf32>
    %28 = tpu.matmul %25, %27, %cst_12 {dimension_numbers = #tpu.dot_dimension_numbers<[1], [0], [0], [1], [0, 0, 1, 1], [], []>} : vector<64x64xbf16>, vector<64x128xbf16>, vector<64x128xf32> -> vector<64x128xf32>
    %29 = arith.addf %22, %28 : vector<64x128xf32>
    %30 = vector.extract_strided_slice %21 {offsets = [0, 0, 1, 0], sizes = [1, 8, 8, 64], strides = [1, 1, 1, 1]} : vector<1x10x10x64xf32> to vector<1x8x8x64xf32>
    %31 = vector.shape_cast %30 : vector<1x8x8x64xf32> to vector<64x64xf32>
    %32 = arith.truncf %31 : vector<64x64xf32> to vector<64x64xbf16>
    %c1 = arith.constant 1 : index
    %c0_13 = arith.constant 0 : index
    %c0_14 = arith.constant 0 : index
    %33 = vector.load %arg4[%c1, %c0_13, %c0_14] : memref<9x64x128xbf16, #tpu.memory_space<vmem>>, vector<1x64x128xbf16>
    %34 = vector.shape_cast %33 : vector<1x64x128xbf16> to vector<64x128xbf16>
    %cst_15 = arith.constant dense<0.000000e+00> : vector<64x128xf32>
    %35 = tpu.matmul %32, %34, %cst_15 {dimension_numbers = #tpu.dot_dimension_numbers<[1], [0], [0], [1], [0, 0, 1, 1], [], []>} : vector<64x64xbf16>, vector<64x128xbf16>, vector<64x128xf32> -> vector<64x128xf32>
    %36 = arith.addf %29, %35 : vector<64x128xf32>
    %37 = vector.extract_strided_slice %21 {offsets = [0, 0, 2, 0], sizes = [1, 8, 8, 64], strides = [1, 1, 1, 1]} : vector<1x10x10x64xf32> to vector<1x8x8x64xf32>
    %38 = vector.shape_cast %37 : vector<1x8x8x64xf32> to vector<64x64xf32>
    %39 = arith.truncf %38 : vector<64x64xf32> to vector<64x64xbf16>
    %c2 = arith.constant 2 : index
    %c0_16 = arith.constant 0 : index
    %c0_17 = arith.constant 0 : index
    %40 = vector.load %arg4[%c2, %c0_16, %c0_17] : memref<9x64x128xbf16, #tpu.memory_space<vmem>>, vector<1x64x128xbf16>
    %41 = vector.shape_cast %40 : vector<1x64x128xbf16> to vector<64x128xbf16>
    %cst_18 = arith.constant dense<0.000000e+00> : vector<64x128xf32>
    %42 = tpu.matmul %39, %41, %cst_18 {dimension_numbers = #tpu.dot_dimension_numbers<[1], [0], [0], [1], [0, 0, 1, 1], [], []>} : vector<64x64xbf16>, vector<64x128xbf16>, vector<64x128xf32> -> vector<64x128xf32>
    %43 = arith.addf %36, %42 : vector<64x128xf32>
    %44 = vector.extract_strided_slice %21 {offsets = [0, 1, 0, 0], sizes = [1, 8, 8, 64], strides = [1, 1, 1, 1]} : vector<1x10x10x64xf32> to vector<1x8x8x64xf32>
    %45 = vector.shape_cast %44 : vector<1x8x8x64xf32> to vector<64x64xf32>
    %46 = arith.truncf %45 : vector<64x64xf32> to vector<64x64xbf16>
    %c3 = arith.constant 3 : index
    %c0_19 = arith.constant 0 : index
    %c0_20 = arith.constant 0 : index
    %47 = vector.load %arg4[%c3, %c0_19, %c0_20] : memref<9x64x128xbf16, #tpu.memory_space<vmem>>, vector<1x64x128xbf16>
    %48 = vector.shape_cast %47 : vector<1x64x128xbf16> to vector<64x128xbf16>
    %cst_21 = arith.constant dense<0.000000e+00> : vector<64x128xf32>
    %49 = tpu.matmul %46, %48, %cst_21 {dimension_numbers = #tpu.dot_dimension_numbers<[1], [0], [0], [1], [0, 0, 1, 1], [], []>} : vector<64x64xbf16>, vector<64x128xbf16>, vector<64x128xf32> -> vector<64x128xf32>
    %50 = arith.addf %43, %49 : vector<64x128xf32>
    %51 = vector.extract_strided_slice %21 {offsets = [0, 1, 1, 0], sizes = [1, 8, 8, 64], strides = [1, 1, 1, 1]} : vector<1x10x10x64xf32> to vector<1x8x8x64xf32>
    %52 = vector.shape_cast %51 : vector<1x8x8x64xf32> to vector<64x64xf32>
    %53 = arith.truncf %52 : vector<64x64xf32> to vector<64x64xbf16>
    %c4 = arith.constant 4 : index
    %c0_22 = arith.constant 0 : index
    %c0_23 = arith.constant 0 : index
    %54 = vector.load %arg4[%c4, %c0_22, %c0_23] : memref<9x64x128xbf16, #tpu.memory_space<vmem>>, vector<1x64x128xbf16>
    %55 = vector.shape_cast %54 : vector<1x64x128xbf16> to vector<64x128xbf16>
    %cst_24 = arith.constant dense<0.000000e+00> : vector<64x128xf32>
    %56 = tpu.matmul %53, %55, %cst_24 {dimension_numbers = #tpu.dot_dimension_numbers<[1], [0], [0], [1], [0, 0, 1, 1], [], []>} : vector<64x64xbf16>, vector<64x128xbf16>, vector<64x128xf32> -> vector<64x128xf32>
    %57 = arith.addf %50, %56 : vector<64x128xf32>
    %58 = vector.extract_strided_slice %21 {offsets = [0, 1, 2, 0], sizes = [1, 8, 8, 64], strides = [1, 1, 1, 1]} : vector<1x10x10x64xf32> to vector<1x8x8x64xf32>
    %59 = vector.shape_cast %58 : vector<1x8x8x64xf32> to vector<64x64xf32>
    %60 = arith.truncf %59 : vector<64x64xf32> to vector<64x64xbf16>
    %c5 = arith.constant 5 : index
    %c0_25 = arith.constant 0 : index
    %c0_26 = arith.constant 0 : index
    %61 = vector.load %arg4[%c5, %c0_25, %c0_26] : memref<9x64x128xbf16, #tpu.memory_space<vmem>>, vector<1x64x128xbf16>
    %62 = vector.shape_cast %61 : vector<1x64x128xbf16> to vector<64x128xbf16>
    %cst_27 = arith.constant dense<0.000000e+00> : vector<64x128xf32>
    %63 = tpu.matmul %60, %62, %cst_27 {dimension_numbers = #tpu.dot_dimension_numbers<[1], [0], [0], [1], [0, 0, 1, 1], [], []>} : vector<64x64xbf16>, vector<64x128xbf16>, vector<64x128xf32> -> vector<64x128xf32>
    %64 = arith.addf %57, %63 : vector<64x128xf32>
    %65 = vector.extract_strided_slice %21 {offsets = [0, 2, 0, 0], sizes = [1, 8, 8, 64], strides = [1, 1, 1, 1]} : vector<1x10x10x64xf32> to vector<1x8x8x64xf32>
    %66 = vector.shape_cast %65 : vector<1x8x8x64xf32> to vector<64x64xf32>
    %67 = arith.truncf %66 : vector<64x64xf32> to vector<64x64xbf16>
    %c6 = arith.constant 6 : index
    %c0_28 = arith.constant 0 : index
    %c0_29 = arith.constant 0 : index
    %68 = vector.load %arg4[%c6, %c0_28, %c0_29] : memref<9x64x128xbf16, #tpu.memory_space<vmem>>, vector<1x64x128xbf16>
    %69 = vector.shape_cast %68 : vector<1x64x128xbf16> to vector<64x128xbf16>
    %cst_30 = arith.constant dense<0.000000e+00> : vector<64x128xf32>
    %70 = tpu.matmul %67, %69, %cst_30 {dimension_numbers = #tpu.dot_dimension_numbers<[1], [0], [0], [1], [0, 0, 1, 1], [], []>} : vector<64x64xbf16>, vector<64x128xbf16>, vector<64x128xf32> -> vector<64x128xf32>
    %71 = arith.addf %64, %70 : vector<64x128xf32>
    %72 = vector.extract_strided_slice %21 {offsets = [0, 2, 1, 0], sizes = [1, 8, 8, 64], strides = [1, 1, 1, 1]} : vector<1x10x10x64xf32> to vector<1x8x8x64xf32>
    %73 = vector.shape_cast %72 : vector<1x8x8x64xf32> to vector<64x64xf32>
    %74 = arith.truncf %73 : vector<64x64xf32> to vector<64x64xbf16>
    %c7 = arith.constant 7 : index
    %c0_31 = arith.constant 0 : index
    %c0_32 = arith.constant 0 : index
    %75 = vector.load %arg4[%c7, %c0_31, %c0_32] : memref<9x64x128xbf16, #tpu.memory_space<vmem>>, vector<1x64x128xbf16>
    %76 = vector.shape_cast %75 : vector<1x64x128xbf16> to vector<64x128xbf16>
    %cst_33 = arith.constant dense<0.000000e+00> : vector<64x128xf32>
    %77 = tpu.matmul %74, %76, %cst_33 {dimension_numbers = #tpu.dot_dimension_numbers<[1], [0], [0], [1], [0, 0, 1, 1], [], []>} : vector<64x64xbf16>, vector<64x128xbf16>, vector<64x128xf32> -> vector<64x128xf32>
    %78 = arith.addf %71, %77 : vector<64x128xf32>
    %79 = vector.extract_strided_slice %21 {offsets = [0, 2, 2, 0], sizes = [1, 8, 8, 64], strides = [1, 1, 1, 1]} : vector<1x10x10x64xf32> to vector<1x8x8x64xf32>
    %80 = vector.shape_cast %79 : vector<1x8x8x64xf32> to vector<64x64xf32>
    %81 = arith.truncf %80 : vector<64x64xf32> to vector<64x64xbf16>
    %c8 = arith.constant 8 : index
    %c0_34 = arith.constant 0 : index
    %c0_35 = arith.constant 0 : index
    %82 = vector.load %arg4[%c8, %c0_34, %c0_35] : memref<9x64x128xbf16, #tpu.memory_space<vmem>>, vector<1x64x128xbf16>
    %83 = vector.shape_cast %82 : vector<1x64x128xbf16> to vector<64x128xbf16>
    %cst_36 = arith.constant dense<0.000000e+00> : vector<64x128xf32>
    %84 = tpu.matmul %81, %83, %cst_36 {dimension_numbers = #tpu.dot_dimension_numbers<[1], [0], [0], [1], [0, 0, 1, 1], [], []>} : vector<64x64xbf16>, vector<64x128xbf16>, vector<64x128xf32> -> vector<64x128xf32>
    %85 = arith.addf %78, %84 : vector<64x128xf32>
    %c0_37 = arith.constant 0 : index
    %c0_38 = arith.constant 0 : index
    %86 = vector.load %arg5[%c0_37, %c0_38] : memref<1x128xf32, #tpu.memory_space<vmem>>, vector<1x128xf32>
    %87 = vector.broadcast %86 : vector<1x128xf32> to vector<64x128xf32>
    %88 = arith.addf %85, %87 : vector<64x128xf32>
    %c0_39 = arith.constant 0 : index
    %c0_40 = arith.constant 0 : index
    %89 = vector.load %arg6[%c0_39, %c0_40] : memref<64x128xf32, #tpu.memory_space<vmem>>, vector<64x128xf32>
    tpu.vector_store %arg6[%c0_39, %c0_40], %88 {strides = array<i32>} : memref<64x128xf32, #tpu.memory_space<vmem>>, vector<64x128xf32>,
    %90 = tpu.iota {dimensions = array<i32: 0>} : vector<64x1xi32>
    %c9_i32 = arith.constant 9 : i32
    %91 = vector.broadcast %c9_i32 : i32 to vector<64x1xi32>
    %92 = arith.andi %90, %91 : vector<64x1xi32>
    %c0_i32 = arith.constant 0 : i32
    %93 = vector.broadcast %c0_i32 : i32 to vector<64x1xi32>
    %94 = arith.cmpi eq, %92, %93 : vector<64x1xi32>
    %95 = arith.extui %94 : vector<64x1xi1> to vector<64x1xi32>
    %96 = arith.sitofp %95 : vector<64x1xi32> to vector<64x1xf32>
    %97 = vector.broadcast %96 : vector<64x1xf32> to vector<64x128xf32>
    %98 = arith.mulf %88, %97 : vector<64x128xf32>
    %cst_41 = arith.constant dense<0.000000e+00> : vector<128xf32>
    %99 = vector.multi_reduction <add>, %98, %cst_41 [0] : vector<64x128xf32> to vector<128xf32>
    %100 = vector.shape_cast %99 : vector<128xf32> to vector<1x128xf32>
    %101 = arith.mulf %88, %88 : vector<64x128xf32>
    %102 = vector.broadcast %96 : vector<64x1xf32> to vector<64x128xf32>
    %103 = arith.mulf %101, %102 : vector<64x128xf32>
    %cst_42 = arith.constant dense<0.000000e+00> : vector<128xf32>
    %104 = vector.multi_reduction <add>, %103, %cst_42 [0] : vector<64x128xf32> to vector<128xf32>
    %105 = vector.shape_cast %104 : vector<128xf32> to vector<1x128xf32>
    %106 = tpu.concatenate %100, %105 in 0 : vector<1x128xf32>, vector<1x128xf32> -> vector<2x128xf32>
    %107 = vector.shape_cast %106 : vector<2x128xf32> to vector<1x2x128xf32>
    %c0_43 = arith.constant 0 : index
    %c0_44 = arith.constant 0 : index
    %c0_45 = arith.constant 0 : index
    %108 = vector.load %arg7[%c0_43, %c0_44, %c0_45] : memref<1x2x128xf32, #tpu.memory_space<vmem>>, vector<1x2x128xf32>
    tpu.vector_store %arg7[%c0_43, %c0_44, %c0_45], %107 {strides = array<i32>} : memref<1x2x128xf32, #tpu.memory_space<vmem>>, vector<1x2x128xf32>,
    return
  }
  func.func @transform_0(%arg0: i32) -> (i32, i32) {
    %c0_i32 = arith.constant 0 : i32
    %c0_i32_0 = arith.constant 0 : i32
    return %arg0, %c0_i32 : i32, i32
  }
  func.func @transform_1(%arg0: i32) -> (i32, i32) {
    %c0_i32 = arith.constant 0 : i32
    %c0_i32_0 = arith.constant 0 : i32
    %c0_i32_1 = arith.constant 0 : i32
    return %c0_i32, %c0_i32_0 : i32, i32
  }
  func.func @transform_2(%arg0: i32) -> (i32, i32) {
    %c0_i32 = arith.constant 0 : i32
    %c0_i32_0 = arith.constant 0 : i32
    %c0_i32_1 = arith.constant 0 : i32
    return %c0_i32, %c0_i32_0 : i32, i32
  }
  func.func @transform_3(%arg0: i32) -> (i32, i32, i32) {
    %c0_i32 = arith.constant 0 : i32
    %c0_i32_0 = arith.constant 0 : i32
    %c0_i32_1 = arith.constant 0 : i32
    %c0_i32_2 = arith.constant 0 : i32
    return %c0_i32, %c0_i32_0, %c0_i32_1 : i32, i32, i32
  }
  func.func @transform_4(%arg0: i32) -> (i32, i32) {
    %c0_i32 = arith.constant 0 : i32
    %c0_i32_0 = arith.constant 0 : i32
    %c0_i32_1 = arith.constant 0 : i32
    return %c0_i32, %c0_i32_0 : i32, i32
  }
  func.func @transform_5(%arg0: i32) -> (i32, i32) {
    %c0_i32 = arith.constant 0 : i32
    %c0_i32_0 = arith.constant 0 : i32
    return %arg0, %c0_i32 : i32, i32
  }
  func.func @transform_6(%arg0: i32) -> (i32, i32, i32) {
    %c0_i32 = arith.constant 0 : i32
    %c0_i32_0 = arith.constant 0 : i32
    %c0_i32_1 = arith.constant 0 : i32
    return %arg0, %c0_i32, %c0_i32_0 : i32, i32, i32
  }
}

</mosaic_0001>

<bundles_post_ra>
// kernel: discriminator_forward.5
= control target key start
LH: loop header
LB: loop body
LE: loop exit
PB: predicated region body
PF: predicated region fallthrough
CT: control target
= control target key end

     0   :  { %s388_s4 = inlined_call_operand.<no memory space> [shape: f32[1,1], index: 4, kind: input, shape index: {}]   ;;  %s389_s0 = inlined_call_operand.vmem [shape: f32[128,128], index: 0, kind: input, shape index: {}]   ;;  %s390_s1 = inlined_call_operand.vmem [shape: f32[1,128], index: 1, kind: input, shape index: {}]   ;;  %s391_s2 = inlined_call_operand.vmem [shape: f32[1,128], index: 2, kind: input, shape index: {}]   ;;  %s392_s3 = inlined_call_operand.vmem [shape: f32[64,128], index: 3, kind: input, shape index: {}]   ;;  %s393_s5 = inlined_call_operand.vmem [shape: f32[2,1], index: 5, kind: output, shape index: {}]  }
   0x1   :  { %v10_v0 = vstv %s388_s4  ;;  %v22_v1 = vld [vmem:[%s389_s0] sm:$0xff]  ;;  %v23_v2 = vld [vmem:[%s389_s0 + $0x8] sm:$0xff]  ;;  %v24_v3 = vld [vmem:[%s389_s0 + $0x10] sm:$0xff] }
   0x2   :  { %11 = vst [vmem:[#allocation2] sm:$0x1] %v10_v0  ;;  %v25_v4 = vld [vmem:[%s389_s0 + $0x18] sm:$0xff]  ;;  %v215_v5 = vld [vmem:[%s390_s1] ss:$0 sm:$0xff]  ;;  %v27_v7 = vld [vmem:[%s389_s0 + $0x28] sm:$0xff] }
   0x3   :  { %v26_v6 = vld [vmem:[%s389_s0 + $0x20] sm:$0xff]  ;;  %v28_v8 = vld [vmem:[%s389_s0 + $0x30] sm:$0xff]  ;;  %v29_v9 = vld [vmem:[%s389_s0 + $0x38] sm:$0xff]  ;;  %v45_v15 = vmul.f32 %v215_v5, %v22_v1  ;;  %v46_v18 = vmul.f32 %v215_v5, %v23_v2  ;;  %v47_v19 = vmul.f32 %v215_v5, %v24_v3  ;;  %v48_v20 = vmul.f32 %v215_v5, %v25_v4 }
   0x4   :  { %v30_v10 = vld [vmem:[%s389_s0 + $0x40] sm:$0xff]  ;;  %v31_v11 = vld [vmem:[%s389_s0 + $0x48] sm:$0xff]  ;;  %v32_v12 = vld [vmem:[%s389_s0 + $0x50] sm:$0xff]  ;;  %v49_v23 = vmul.f32 %v215_v5, %v26_v6  ;;  %v50_v24 = vmul.f32 %v215_v5, %v27_v7  ;;  %v51_v25 = vmul.f32 %v215_v5, %v28_v8  ;;  %v52_v27 = vmul.f32 %v215_v5, %v29_v9 }
   0x5   :  { %v33_v13 = vld [vmem:[%s389_s0 + $0x58] sm:$0xff]  ;;  %v34_v14 = vld [vmem:[%s389_s0 + $0x60] sm:$0xff]  ;;  %v35_v16 = vld [vmem:[%s389_s0 + $0x68] sm:$0xff]  ;;  %v53_v26 = vmul.f32 %v215_v5, %v30_v10  ;;  %v54_v28 = vmul.f32 %v215_v5, %v31_v11  ;;  %v55_v29 = vmul.f32 %v215_v5, %v32_v12 }
   0x6   :  { %v36_v17 = vld [vmem:[%s389_s0 + $0x70] sm:$0xff]  ;;  %v216_v21 = vld [vmem:[%s391_s2] ss:$0 sm:$0xff]  ;;  %v37_v22 = vld [vmem:[%s389_s0 + $0x78] sm:$0xff]  ;;  %v56_v30 = vmul.f32 %v215_v5, %v33_v13  ;;  %v57_v31 = vmul.f32 %v215_v5, %v34_v14  ;;  %v58_v32 = vmul.f32 %v215_v5, %v35_v16 }
   0x7   :  { %v59_v33 = vmul.f32 %v215_v5, %v36_v17  ;;  %v68_v34 = vadd.f32 %v216_v21, %v45_v15  ;;  %v60_v35 = vmul.f32 %v215_v5, %v37_v22  ;;  %v69_v36 = vadd.f32 %v216_v21, %v46_v18  ;;  %v132_v61 = vld [vmem:[%s392_s3] sm:$0xff]  ;;  %v133_v62 = vld [vmem:[%s392_s3 + $0x8] sm:$0xff]  ;;  %v134_v4 = vld [vmem:[%s392_s3 + $0x10] sm:$0xff] }
   0x8   :  { %v70_v37 = vadd.f32 %v216_v21, %v47_v19  ;;  %v71_v38 = vadd.f32 %v216_v21, %v48_v20  ;;  %v72_v39 = vadd.f32 %v216_v21, %v49_v23  ;;  %v309_v40 = vadd.f32 %v216_v21, %v50_v24  ;;  %v135_v12 = vld [vmem:[%s392_s3 + $0x18] sm:$0xff]  ;;  %v136_v20 = vld [vmem:[%s392_s3 + $0x20] sm:$0xff] }
   0x9   :  { %v311_v41 = vadd.f32 %v216_v21, %v51_v25  ;;  %v76_v42 = vadd.f32 %v216_v21, %v53_v26  ;;  %v313_v43 = vadd.f32 %v216_v21, %v52_v27  ;;  %v77_v44 = vadd.f32 %v216_v21, %v54_v28 }
   0xa   :  { %v78_v45 = vadd.f32 %v216_v21, %v55_v29  ;;  %v79_v46 = vadd.f32 %v216_v21, %v56_v30  ;;  %v80_v47 = vadd.f32 %v216_v21, %v57_v31  ;;  %v315_v48 = vadd.f32 %v216_v21, %v58_v32  ;;  %v137_v30 = vld [vmem:[%s392_s3 + $0x28] sm:$0xff] }
   0xb   :  { %v317_v49 = vadd.f32 %v216_v21, %v59_v33  ;;  %vm84_vm0 = vcmp.gt.f32.partialorder %v68_v34, 0.0  ;;  %vm85_vm1 = vcmp.gt.f32.partialorder %v69_v36, 0.0  ;;  %vm86_vm2 = vcmp.gt.f32.partialorder %v70_v37, 0.0 }
   0xc   :  { %v100_v50 = vmul.f32 0.2, %v68_v34  ;;  %v101_v51 = vmul.f32 0.2, %v69_v36  ;;  %vm87_vm3 = vcmp.gt.f32.partialorder %v71_v38, 0.0  ;;  %vm88_vm4 = vcmp.gt.f32.partialorder %v72_v39, 0.0 }
   0xd   :  { %vm89_vm5 = vcmp.gt.f32.partialorder %v309_v40, 0.0  ;;  %vm92_vm6 = vcmp.gt.f32.partialorder %v76_v42, 0.0  ;;  %v320_v52 = vadd.f32 %v216_v21, %v60_v35  ;;  %v102_v53 = vmul.f32 0.2, %v70_v37 }
   0xe   :  { %v108_v54 = vmul.f32 0.2, %v76_v42  ;;  %v109_v55 = vmul.f32 0.2, %v77_v44  ;;  %vm90_vm7 = vcmp.gt.f32.partialorder %v311_v41, 0.0  ;;  %vm93_vm8 = vcmp.gt.f32.partialorder %v77_v44, 0.0 }
   0xf   :  { %vm94_vm9 = vcmp.gt.f32.partialorder %v78_v45, 0.0  ;;  %vm95_vm10 = vcmp.gt.f32.partialorder %v79_v46, 0.0  ;;  %v110_v56 = vmul.f32 0.2, %v78_v45  ;;  %v103_v57 = vmul.f32 0.2, %v71_v38 }
  0x10   :  { %v111_v58 = vmul.f32 0.2, %v79_v46  ;;  %v116_v59 = vsel %vm84_vm0, %v68_v34, %v100_v50  ;;  %v117_v60 = vsel %vm85_vm1, %v69_v36, %v101_v51  ;;  %vm91_vm11 = vcmp.gt.f32.partialorder %v313_v43, 0.0 }
  0x11   :  { %vm96_vm12 = vcmp.gt.f32.partialorder %v80_v47, 0.0  ;;  %vm97_vm13 = vcmp.gt.f32.partialorder %v315_v48, 0.0  ;;  %vm98_vm14 = vcmp.gt.f32.partialorder %v317_v49, 0.0  ;;  %v104_v63 = vmul.f32 0.2, %v72_v39 }
  0x12   :  { %v112_v0 = vmul.f32 0.2, %v80_v47  ;;  %v118_v1 = vsel %vm86_vm2, %v70_v37, %v102_v53  ;;  %v124_v2 = vsel %vm92_vm6, %v76_v42, %v108_v54  ;;  %v125_v3 = vsel %vm93_vm8, %v77_v44, %v109_v55  ;;  %v138_v37 = vld [vmem:[%s392_s3 + $0x30] sm:$0xff] }
  0x13   :  { %vm99_vm15 = vcmp.gt.f32.partialorder %v320_v52, 0.0  ;;  %v126_v5 = vsel %vm94_vm9, %v78_v45, %v110_v56  ;;  %v140_v6 = vmul.f32 %v132_v61, %v116_v59  ;;  %v141_v7 = vmul.f32 %v133_v62, %v117_v60  ;;  %v139_v45 = vld [vmem:[%s392_s3 + $0x38] sm:$0xff] }
  0x14   :  { %v105_v8 = vmul.f32 0.2, %v309_v40  ;;  %v113_v9 = vmul.f32 0.2, %v315_v48  ;;  %v119_v10 = vsel %vm87_vm3, %v71_v38, %v103_v57  ;;  %v127_v11 = vsel %vm95_vm10, %v79_v46, %v111_v58 }
  0x15   :  { %v106_v13 = vmul.f32 0.2, %v311_v41  ;;  %v142_v14 = vmul.f32 %v134_v4, %v118_v1  ;;  %v148_v15 = vmul.f32 %v132_v61, %v124_v2  ;;  %v149_v16 = vmul.f32 %v133_v62, %v125_v3 }
  0x16   :  { %v114_v17 = vmul.f32 0.2, %v317_v49  ;;  %v120_v18 = vsel %vm88_vm4, %v72_v39, %v104_v63  ;;  %v128_v19 = vsel %vm96_vm12, %v80_v47, %v112_v0  ;;  %v150_v21 = vmul.f32 %v134_v4, %v126_v5 }
  0x17   :  { %v143_v22 = vmul.f32 %v135_v12, %v119_v10  ;;  %v151_v23 = vmul.f32 %v135_v12, %v127_v11  ;;  %v156_v24 = vadd.f32 %v141_v7, %v140_v6  ;;  %v169_v25 = vadd.f32 %v149_v16, %v148_v15  ;;  %v217_v7 = vld [vmem:[#allocation2] ss:$0 sm:$0xff] }
  0x18   :  { %v107_v26 = vmul.f32 0.2, %v313_v43  ;;  %v115_v27 = vmul.f32 0.2, %v320_v52  ;;  %v121_v28 = vsel %vm89_vm5, %v309_v40, %v105_v8  ;;  %v129_v29 = vsel %vm97_vm13, %v315_v48, %v113_v9 }
  0x19   :  { %v144_v31 = vmul.f32 %v136_v20, %v120_v18  ;;  %v152_v32 = vmul.f32 %v136_v20, %v128_v19  ;;  %v157_v33 = vadd.f32 %v156_v24, %v142_v14  ;;  %v170_v34 = vadd.f32 %v169_v25, %v150_v21 }
  0x1a   :  { %v122_v35 = vsel %vm90_vm7, %v311_v41, %v106_v13  ;;  %v130_v36 = vsel %vm98_vm14, %v317_v49, %v114_v17  ;;  %v145_v38 = vmul.f32 %v137_v30, %v121_v28  ;;  %v153_v39 = vmul.f32 %v137_v30, %v129_v29 }
  0x1b   :  { %v158_v40 = vadd.f32 %v157_v33, %v143_v22  ;;  %v171_v42 = vadd.f32 %v170_v34, %v151_v23  ;;  %v123_v44 = vsel %vm91_vm11, %v313_v43, %v107_v26  ;;  %v131_v41 = vsel %vm99_vm15, %v320_v52, %v115_v27 }
  0x1c   :  { %v146_v46 = vmul.f32 %v138_v37, %v122_v35  ;;  %v154_v47 = vmul.f32 %v138_v37, %v130_v36  ;;  %v147_v50 = vmul.f32 %v139_v45, %v123_v44  ;;  %v155_v51 = vmul.f32 %v139_v45, %v131_v41 }
  0x1d   :  { %v159_v48 = vadd.f32 %v158_v40, %v144_v31  ;;  %v172_v49 = vadd.f32 %v171_v42, %v152_v32  ;;  %vm184_vm0 = vcmask 1041409   ;;  %vm187_vm1 = vcmask 1041408  }
  0x1e   :  { %vm209_vm2 = vcmask 1024  }
  0x1f   :  { %v160_v53 = vadd.f32 %v159_v48, %v145_v38  ;;  %v173_v54 = vadd.f32 %v172_v49, %v153_v39 }
  0x21   :  { %v161_v55 = vadd.f32 %v160_v53, %v146_v46  ;;  %v174_v56 = vadd.f32 %v173_v54, %v154_v47 }
  0x23   :  { %v162_v57 = vadd.f32 %v161_v55, %v147_v50  ;;  %v175_v43 = vadd.f32 %v174_v56, %v155_v51 }
  0x25   :  { %v163_v58 = vrot.slane %v162_v57, 4  ;;  %v176_v59 = vrot.slane %v175_v43, 4 }
  0x27   :  { %v164_v60 = vadd.f32 %v163_v58, %v162_v57  ;;  %v177_v52 = vadd.f32 %v176_v59, %v175_v43 }
  0x29   :  { %v165_v61 = vrot.slane %v164_v60, 2  ;;  %v178_v62 = vrot.slane %v177_v52, 2 }
  0x2b   :  { %v166_v63 = vadd.f32 %v165_v61, %v164_v60  ;;  %v179_v0 = vadd.f32 %v178_v62, %v177_v52 }
  0x2d   :  { %v167_v1 = vrot.slane %v166_v63, 1  ;;  %v180_v2 = vrot.slane %v179_v0, 1 }
  0x2f   :  { %v168_v3 = vadd.f32 %v167_v1, %v166_v63  ;;  %v181_v4 = vadd.f32 %v180_v2, %v179_v0 }
  0x31   :  { %v185_v5 = vsel %vm184_vm0, %v181_v4, %v168_v3 }
  0x32   :  { %v188_v6 = vsel %vm187_vm1, %v185_v5, 0.0 }
  0x33   :  { %189 = vadd.xlane.f32.xlu0 %v188_v6 }
  0xc0   :  { %v190_v8 = vpop.xlane.xlu0 %189 }
  0xc1   :  { %v198_v9 = vadd.f32 %v217_v7, %v190_v8 }
  0xc3   :  { %v199_v10 = vand.u32 2147483647, %v198_v9  ;;  %vm203_vm3 = vcmp.ge.f32.partialorder %v198_v9, 0.0 }
  0xc5   :  { %v200_v11 = vsub.f32 0.0, %v199_v10 }
  0xc7   :  { %v201_v12 = vmul.f32 1.442695, %v200_v11 }
  0xc9   :  { %218 = vpow2.f32 %v201_v12 }
  0xd3   :  { %v219_v13 = vpop.eup %218 }
  0xd4   :  { %v204_v14 = vadd.f32 1.0, %v219_v13 }
  0xd6   :  { %220 = vrcp.f32 %v204_v14 }
  0xe0   :  { %v221_v15 = vpop.eup %220 }
  0xe1   :  { %v207_v16 = vmul.f32 %v221_v15, %v219_v13 }
  0xe3   :  { %v208_v17 = vsel %vm203_vm3, %v221_v15, %v207_v16 }
  0xe4   :  { %210 = vst.msk [vmem:[%s393_s5] sm:$0x3] %vm209_vm2, %v208_v17 }

// kernel: discriminator_forward.4
= control target key start
LH: loop header
LB: loop body
LE: loop exit
PB: predicated region body
PF: predicated region fallthrough
CT: control target
= control target key end

     0   :  { %s2262_s21 = smov 0   ;;  %s2665_s0 = inlined_call_operand.vmem [shape: f32[64,128], index: 0, kind: input, shape index: {}]   ;;  %s2666_s1 = inlined_call_operand.vmem [shape: f32[1,64], index: 1, kind: input, shape index: {}]   ;;  %s2667_s2 = inlined_call_operand.vmem [shape: f32[1,64], index: 2, kind: input, shape index: {}]   ;;  %s2668_s3 = inlined_call_operand.vmem [shape: bf16[9,64,128], index: 3, kind: input, shape index: {}]   ;;  %s2669_s4 = inlined_call_operand.vmem [shape: f32[1,128], index: 4, kind: input, shape index: {}]   ;;  %s2670_s5 = inlined_call_operand.vmem [shape: f32[128,128], index: 5, kind: output, shape index: {0}]   ;;  %s2671_s6 = inlined_call_operand.vmem [shape: f32[2,2,128], index: 6, kind: output, shape index: {1}]  }
   0x1 LB: > { %s2268_s22 = sadd.s32 4294967295, %s2223_s21   ;;  %p1732_p0 = scmp.ge.s32.totalorder %s2223_s21, 1  ;;  %s2223_s21 = sphi %s2262_s21, %s17_s21  }
   0x2   : > { %p216_p1 = scmp.lt.s32.totalorder %s2223_s21, 3 }
   0x4   : > { %p217_p2 = pnand %p1732_p0, %p216_p1 }
   0x5   : > { %s1733_s23 = sshll.u32 (!%p217_p2), %s2268_s22, 2  ;;  %vm368_vm0 = vcmask (!%p217_p2), 1040384   ;;  %v2181_v0 = vld [vmem:[%s2668_s3 + $0x20] sm:$0xff] (!%p217_p2)   ;;  %v2183_v3 = vld [vmem:[%s2668_s3 + $0x28] sm:$0xff] (!%p217_p2)   ;;  %v2225_v4 = vmov (!%p217_p2), 0.0   ;;  %v2185_v8 = vld [vmem:[%s2668_s3 + $0x30] sm:$0xff] (!%p217_p2)  }
   0x6   : > { %220 = sbr.rel (%p217_p2) target bundleno = 462 (0x1ce), region = 40  ;;  %p251_p3 = scmp.lt.s32.totalorder (!%p217_p2), %s1733_s23, 7  ;;  %v2279_v1 = vld [vmem:[%s2666_s1] ss:$0 sm:$0xff] (!%p217_p2)  ;;  %1955 = vmatprep.subr.bf16.mxu1 (!%p217_p2), %v2181_v0  ;;  %v350_v5 = vrot.slane (!%p217_p2), %v2225_v4, 7  ;;  %v2184_v7 = vld [vmem:[%s2668_s3 + $0x88] sm:$0xff] (!%p217_p2)  }
   0x7   : > { %v2182_v2 = vld [vmem:[%s2668_s3 + $0x80] sm:$0xff] (!%p217_p2)   ;;  %1956 = vmatpush3.bf16.msra.mxu1 (!%p217_p2), %v2181_v0  ;;  %s2226_s18 = smov (!%p217_p2), 64   ;;  %v2186_v17 = vld [vmem:[%s2668_s3 + $0x90] sm:$0xff] (!%p217_p2)   ;;  %v2187_v23 = vld [vmem:[%s2668_s3 + $0x38] sm:$0xff] (!%p217_p2)   ;;  %vm415_vm5 = vcmask (!%p217_p2), 1046528   ;;  %vm485_vm6 = vcmask (!%p217_p2), 523264  }
   0x8   : > { %v2291_v6 = vld [vmem:[%s2667_s2] ss:$0 sm:$0xff] (!%p217_p2)  ;;  %2019 = vmatprep.subr.bf16.mxu0 (!%p217_p2), %v2182_v2  ;;  %1957 = vmatprep.subr.bf16.mxu1 (!%p217_p2), %v2183_v3  ;;  %v2303_v12 = vsel (!%p217_p2), %vm368_vm0, 0.0, %v350_v5  ;;  %v2312_v18 = vsel (!%p217_p2), %vm368_vm0, %v350_v5, 0.0  ;;  %v2188_v26 = vld [vmem:[%s2668_s3 + $0x98] sm:$0xff] (!%p217_p2)   ;;  %vm664_vm7 = vcmask (!%p217_p2), 1045504  }
   0x9   : > { %2020 = vmatpush3.bf16.msra.mxu0 (!%p217_p2), %v2182_v2  ;;  %v416_v24 = vrot.slane (!%p217_p2), %v2303_v12, 1  ;;  %v417_v27 = vrot.slane (!%p217_p2), %v2312_v18, 1  ;;  %v2330_v30 = vld [vmem:[%s2668_s3] sm:$0xff] (!%p217_p2)   ;;  %p262_p5 = scmp.lt.s32.totalorder (!%p217_p2), %s2268_s22, 1 }
   0xa   : > { %2021 = vmatprep.subr.bf16.mxu0 (!%p217_p2), %v2184_v7  ;;  %v2190_v35 = vld [vmem:[%s2668_s3 + $0xa0] sm:$0xff] (!%p217_p2)  }
   0xb   : > { %1958 = vmatpush3.bf16.msra.mxu1 (!%p217_p2), %v2183_v3  ;;  %v2340_v44 = vsel (!%p217_p2), %vm415_vm5, %v416_v24, %v417_v27  ;;  %v2193_v24 = vld [vmem:[%s2668_s3 + $0x10] sm:$0xff] (!%p217_p2)  }
   0xc   : > { %1959 = vmatprep.subr.bf16.mxu1 (!%p217_p2), %v2185_v8 }
   0xd   : > { %s2673_s23 = smov (!%p251_p3, %s1733_s23), 7  ;;  %2022 = vmatpush3.bf16.msra.mxu0 %v2184_v7 }
   0xe   : > { %s1734_s8 = sshll.u32 %s2673_s23, 3  ;;  %2023 = vmatprep.subr.bf16.mxu0 %v2186_v17 }
   0xf   : > { %s254_s15 = scalar_lea.vmem %s2665_s0, %s1734_s8  ;;  %1960 = vmatpush3.bf16.msra.mxu1 %v2185_v8 }
  0x10   : > { %v269_v9 = vld [vmem:[%s254_s15 + $0x10] sm:$0xff]  ;;  %v267_v10 = vld [vmem:[%s254_s15] sm:$0xff]  ;;  %v270_v11 = vld [vmem:[%s254_s15 + $0x18] sm:$0xff]  ;;  %1961 = vmatprep.subr.bf16.mxu1 %v2187_v23 }
  0x11   : > { %279 = vrot.lane.b32.xlu1 %v269_v9, %s2226_s18  ;;  %v296_v13 = vmul.f32 %v2279_v1, %v269_v9  ;;  %275 = vrot.lane.b32.xlu0 %v267_v10, %s2226_s18  ;;  %v294_v14 = vmul.f32 %v2279_v1, %v267_v10  ;;  %v297_v15 = vmul.f32 %v2279_v1, %v270_v11  ;;  %v268_v16 = vld [vmem:[%s254_s15 + $0x8] sm:$0xff]  ;;  %s1735_s15 = sshll.u32 %s2268_s22, 3  ;;  %s2677_s22 = smov (!%p262_p5, %s2268_s22), 1 }
  0x12   : > { %v295_v19 = vmul.f32 %v2279_v1, %v268_v16  ;;  %2024 = vmatpush3.bf16.msra.mxu0 %v2186_v17  ;;  %v2192_v17 = vld [vmem:[%s2668_s3 + $0xa8] sm:$0xff]   ;;  %p257_p4 = scmp.lt.s32.totalorder %s1735_s15, 15  ;;  %s1737_s24 = sshll.u32 %s2677_s22, 1 }
  0x13   : > { %v311_v20 = vadd.f32 %v2291_v6, %v296_v13  ;;  %v309_v21 = vadd.f32 %v2291_v6, %v294_v14  ;;  %v312_v22 = vadd.f32 %v2291_v6, %v297_v15  ;;  %2025 = vmatprep.subr.bf16.mxu0 %v2188_v26  ;;  %1962 = vmatpush3.bf16.msra.mxu1 %v2187_v23  ;;  %v2191_v15 = vld [vmem:[%s2668_s3 + $0x8] sm:$0xff]   ;;  %s265_s27 = scalar_lea.vmem %s2671_s6, %s1737_s24 }
  0x14   : > { %v310_v25 = vadd.f32 %v2291_v6, %v295_v19  ;;  %1971 = vmatprep.subr.bf16.mxu1 %v2330_v30  ;;  %s2675_s15 = smov (!%p257_p4, %s1735_s15), 15 }
  0x15   : > { %vm319_vm1 = vcmp.gt.f32.partialorder %v311_v20, 0.0  ;;  %v327_v28 = vmul.f32 0.2, %v311_v20  ;;  %vm317_vm2 = vcmp.gt.f32.partialorder %v309_v21, 0.0  ;;  %v325_v29 = vmul.f32 0.2, %v309_v21  ;;  %281 = vrot.lane.b32.xlu1 %v270_v11, %s2226_s18  ;;  %277 = vrot.lane.b32.xlu0 %v268_v16, %s2226_s18 }
  0x16   : > { %vm320_vm3 = vcmp.gt.f32.partialorder %v312_v22, 0.0  ;;  %v328_v31 = vmul.f32 0.2, %v312_v22  ;;  %vm318_vm4 = vcmp.gt.f32.partialorder %v310_v25, 0.0  ;;  %v326_v32 = vmul.f32 0.2, %v310_v25  ;;  %2026 = vmatpush3.bf16.msra.mxu0 %v2188_v26 }
  0x17   : > { %v335_v33 = vsel %vm319_vm1, %v311_v20, %v327_v28  ;;  %v333_v34 = vsel %vm317_vm2, %v309_v21, %v325_v29  ;;  %2035 = vmatprep.subr.bf16.mxu0 %v2190_v35  ;;  %v666_v28 = vrot.slane %v2312_v18, 2  ;;  %v2195_v29 = vld [vmem:[%s2668_s3 + $0x18] sm:$0xff]   ;;  %v2426_v18 = vld [vmem:[%s2668_s3 + $0x40] sm:$0xff]   ;;  %s1736_s16 = sshll.u32 %s2675_s15, 3 }
  0x18   : > { %v353_v36 = vrot.slane %v335_v33, 7  ;;  %v351_v37 = vrot.slane %v333_v34, 7  ;;  %v336_v38 = vsel %vm320_vm3, %v312_v22, %v328_v31  ;;  %v334_v39 = vsel %vm318_vm4, %v310_v25, %v326_v32  ;;  %v2194_v25 = vld [vmem:[%s2668_s3 + $0xb0] sm:$0xff]   ;;  %v2431_v32 = vld [vmem:[%s2668_s3 + $0xc0] sm:$0xff]   ;;  %s2636_s23 = scalar_lea.vmem %s2670_s5, %s1736_s16 }
  0x19   : > { %v354_v40 = vrot.slane %v336_v38, 7  ;;  %v352_v41 = vrot.slane %v334_v39, 7  ;;  %v665_v31 = vrot.slane %v2303_v12, 2 }
  0x1a   : > { %v2336_v42 = vsel %vm368_vm0, 0.0, %v353_v36  ;;  %v381_v43 = vsel %vm368_vm0, %v353_v36, 0.0  ;;  %v2344_v47 = vsel %vm368_vm0, 0.0, %v351_v37  ;;  %v379_v48 = vsel %vm368_vm0, %v351_v37, 0.0 }
  0x1b   : > { %v426_v45 = vrot.slane %v381_v43, 1  ;;  %v674_v46 = vrot.slane %v2336_v42, 2  ;;  %v675_v49 = vrot.slane %v381_v43, 2  ;;  %v2349_v50 = vsel %vm368_vm0, 0.0, %v354_v40 }
  0x1c   : > { %v382_v51 = vsel %vm368_vm0, %v354_v40, 0.0  ;;  %v2353_v52 = vsel %vm368_vm0, 0.0, %v352_v41  ;;  %v677_v54 = vrot.slane %v2349_v50, 2  ;;  %v380_v55 = vsel %vm368_vm0, %v352_v41, 0.0 }
  0x1d   : > { %v429_v53 = vrot.slane %v382_v51, 1  ;;  %v2359_v56 = vpack.c.bf16 %v2336_v42, %v2353_v52  ;;  %v678_v57 = vrot.slane %v382_v51, 2  ;;  %v423_v58 = vrot.slane %v380_v55, 1 }
  0x1e   : > { %v419_v59 = vrot.slane %v2344_v47, 1  ;;  %v420_v60 = vrot.slane %v379_v48, 1  ;;  %v669_v61 = vrot.slane %v379_v48, 2  ;;  %v422_v62 = vrot.slane %v2353_v52, 1 }
  0x1f   : > { %v425_v63 = vrot.slane %v2336_v42, 1  ;;  %v428_v0 = vrot.slane %v2349_v50, 1  ;;  %v672_v2 = vrot.slane %v380_v55, 2  ;;  %v668_v5 = vrot.slane %v2344_v47, 2 }
  0x20   : > { %v421_v3 = vsel %vm415_vm5, %v419_v59, %v420_v60  ;;  %v424_v8 = vsel %vm415_vm5, %v422_v62, %v423_v58  ;;  %v671_v19 = vrot.slane %v2353_v52, 2  ;;  %v2388_v20 = vsel %vm664_vm7, %v674_v46, %v675_v49 }
  0x21   : > { %v448_v7 = vpack.c.bf16 %v421_v3, %v2340_v44  ;;  %v427_v9 = vsel %vm415_vm5, %v425_v63, %v426_v45  ;;  %v2371_v10 = vsel %vm415_vm5, %v428_v0, %v429_v53  ;;  %v947_v13 = vpack.c.bf16 %v424_v8, %v421_v3 }
  0x22   : > { %v2373_v11 = vpack.c.bf16 %v427_v9, %v424_v8  ;;  %v948_v14 = vpack.c.bf16 %v2371_v10, %v427_v9  ;;  %v2380_v16 = vsel %vm664_vm7, %v668_v5, %v669_v61  ;;  %v2391_v21 = vsel %vm664_vm7, %v677_v54, %v678_v57 }
  0x23   : > { %1963 = vmatprep.mubr.msk.bf16.mxu1 %vm485_vm6, %v448_v7  ;;  %2027 = vmatprep.mubr.msk.bf16.mxu0 %vm485_vm6, %v947_v13  ;;  %v1074_v22 = vpack.c.bf16 %v2391_v21, %v2388_v20  ;;  %v2401_v23 = vsel %vm664_vm7, %v671_v19, %v672_v2  ;;  %v2434_v33 = vsel %vm664_vm7, %v665_v31, %v666_v28 }
  0x24   : > { %1964 = vmatmul.mubr.msk.bf16.vlgmr.msra.gmra.mrb[0].mxu1 %vm485_vm6, %v2373_v11  ;;  %2028 = vmatmul.mubr.msk.bf16.vlgmr.msra.gmra.mrb[0].mxu0 %vm485_vm6, %v948_v14  ;;  %v2411_v26 = vpack.c.bf16 %v2388_v20, %v2401_v23  ;;  %v1073_v27 = vpack.c.bf16 %v2401_v23, %v2380_v16  ;;  %v697_v34 = vpack.c.bf16 %v2380_v16, %v2434_v33  ;;  %v2202_v20 = vld [vmem:[%s2668_s3 + $0xd0] sm:$0xff]   ;;  %v2207_v16 = vld [vmem:[%s2668_s3 + $0x68] sm:$0xff]  }
  0x25   : > { %1972 = vmatpush3.bf16.msra.mxu1 %v2330_v30  ;;  %2036 = vmatpush3.bf16.msra.mxu0 %v2190_v35  ;;  %v2196_v30 = vld [vmem:[%s2668_s3 + $0xb8] sm:$0xff]   ;;  %v819_v35 = vpack.c.bf16 %v2353_v52, %v2344_v47 }
  0x26   : > { %1973 = vmatprep.subr.bf16.mxu1 %v2191_v15  ;;  %2037 = vmatprep.subr.bf16.mxu0 %v2192_v17 }
  0x29   : > { %1974 = vmatpush3.bf16.msra.mxu1 %v2191_v15  ;;  %2038 = vmatpush3.bf16.msra.mxu0 %v2192_v17 }
  0x2a   : > { %1975 = vmatprep.subr.bf16.mxu1 %v2193_v24  ;;  %2039 = vmatprep.subr.bf16.mxu0 %v2194_v25 }
  0x2d   : > { %1976 = vmatpush3.bf16.msra.mxu1 %v2193_v24  ;;  %2040 = vmatpush3.bf16.msra.mxu0 %v2194_v25 }
  0x2e   : > { %1977 = vmatprep.subr.bf16.mxu1 %v2195_v29  ;;  %2041 = vmatprep.subr.bf16.mxu0 %v2196_v30 }
  0x31   : > { %1978 = vmatpush3.bf16.msra.mxu1 %v2195_v29  ;;  %2042 = vmatpush3.bf16.msra.mxu0 %v2196_v30 }
  0x32   : > { %1987 = vmatprep.subr.bf16.mxu1 %v2426_v18  ;;  %2051 = vmatprep.subr.bf16.mxu0 %v2431_v32 }
  0x83   : > { %v280_v36 = vpop.permute.xlu1 %279  ;;  %v276_v37 = vpop.permute.xlu0 %275 }
  0x84   : > { %v300_v38 = vmul.f32 %v2279_v1, %v280_v36  ;;  %v298_v39 = vmul.f32 %v2279_v1, %v276_v37 }
  0x86   : > { %v315_v40 = vadd.f32 %v2291_v6, %v300_v38  ;;  %v313_v41 = vadd.f32 %v2291_v6, %v298_v39  ;;  %v387_v38 = vpack.c.bf16 %v2344_v47, %v2303_v12  ;;  %v2214_v47 = vld [vmem:[%s2668_s3 + $0x108] sm:$0xff]  }
  0x87   : > { %v282_v43 = vpop.permute.xlu1 %281  ;;  %v278_v45 = vpop.permute.xlu0 %277 }
  0x88   : > { %vm323_vm8 = vcmp.gt.f32.partialorder %v315_v40, 0.0  ;;  %v331_v46 = vmul.f32 0.2, %v315_v40  ;;  %vm321_vm9 = vcmp.gt.f32.partialorder %v313_v41, 0.0  ;;  %v329_v48 = vmul.f32 0.2, %v313_v41 }
  0x89   : > { %v301_v49 = vmul.f32 %v2279_v1, %v282_v43  ;;  %v299_v51 = vmul.f32 %v2279_v1, %v278_v45 }
  0x8a   : > { %v339_v53 = vsel %vm323_vm8, %v315_v40, %v331_v46  ;;  %v337_v54 = vsel %vm321_vm9, %v313_v41, %v329_v48 }
  0x8b   : > { %v355_v55 = vrot.slane %v337_v54, 7  ;;  %v316_v57 = vadd.f32 %v2291_v6, %v301_v49  ;;  %v314_v58 = vadd.f32 %v2291_v6, %v299_v51  ;;  %v357_v59 = vrot.slane %v339_v53, 7  ;;  %v2199_v51 = vld [vmem:[%s2668_s3 + $0x48] sm:$0xff]  }
  0x8d   : > { %v2451_v60 = vsel %vm368_vm0, 0.0, %v355_v55  ;;  %v383_v61 = vsel %vm368_vm0, %v355_v55, 0.0  ;;  %vm324_vm10 = vcmp.gt.f32.partialorder %v316_v57, 0.0  ;;  %v332_v63 = vmul.f32 0.2, %v316_v57 }
  0x8e   : > { %v432_v62 = vrot.slane %v383_v61, 1  ;;  %vm322_vm11 = vcmp.gt.f32.partialorder %v314_v58, 0.0  ;;  %v330_v0 = vmul.f32 0.2, %v314_v58  ;;  %v2455_v1 = vsel %vm368_vm0, 0.0, %v357_v59 }
  0x8f   : > { %v2458_v2 = vsel %vm368_vm0, %v357_v59, 0.0  ;;  %v431_v3 = vrot.slane %v2451_v60, 1  ;;  %v340_v6 = vsel %vm324_vm10, %v316_v57, %v332_v63  ;;  %v437_v14 = vrot.slane %v2455_v1, 1 }
  0x90   : > { %v338_v5 = vsel %vm322_vm11, %v314_v58, %v330_v0  ;;  %v358_v7 = vrot.slane %v340_v6, 7  ;;  %v438_v13 = vrot.slane %v2458_v2, 1  ;;  %v681_v46 = vrot.slane %v383_v61, 2  ;;  %v2201_v58 = vld [vmem:[%s2668_s3 + $0x50] sm:$0xff]   ;;  %v2204_v0 = vld [vmem:[%s2668_s3 + $0xd8] sm:$0xff]  }
  0x91   : > { %v356_v8 = vrot.slane %v338_v5, 7  ;;  %v433_v9 = vsel %vm415_vm5, %v431_v3, %v432_v62  ;;  %v680_v48 = vrot.slane %v2451_v60, 2  ;;  %v389_v53 = vpack.c.bf16 %v2451_v60, %v2349_v50  ;;  %v2206_v3 = vld [vmem:[%s2668_s3 + $0xe0] sm:$0xff]   ;;  %v2210_v6 = vld [vmem:[%s2668_s3 + $0xf0] sm:$0xff]  }
  0x92   : > { %v2465_v15 = vpack.c.bf16 %v433_v9, %v2371_v10  ;;  %v2468_v17 = vsel %vm368_vm0, 0.0, %v358_v7  ;;  %v386_v19 = vsel %vm368_vm0, %v358_v7, 0.0  ;;  %v439_v31 = vsel %vm415_vm5, %v437_v14, %v438_v13  ;;  %v2211_v7 = vld [vmem:[%s2668_s3 + $0x78] sm:$0xff]   ;;  %v2213_v13 = vld [vmem:[%s2668_s3 + $0x100] sm:$0xff]  }
  0x93   : > { %v2472_v24 = vsel %vm368_vm0, 0.0, %v356_v8  ;;  %v384_v25 = vsel %vm368_vm0, %v356_v8, 0.0  ;;  %v943_v29 = vrot.slane %v2468_v17, 1  ;;  %v944_v30 = vrot.slane %v386_v19, 1 }
  0x94   : > { %v435_v28 = vrot.slane %v384_v25, 1  ;;  %1967 = vmatprep.mubr.msk.bf16.mxu1 %vm485_vm6, %v2465_v15  ;;  %v434_v10 = vrot.slane %v2472_v24, 1  ;;  %v684_v43 = vrot.slane %v384_v25, 2  ;;  %v683_v45 = vrot.slane %v2472_v24, 2 }
  0x95   : > { %v2481_v36 = vsel %vm415_vm5, %v943_v29, %v944_v30  ;;  %v682_v23 = vsel %vm664_vm7, %v680_v48, %v681_v46  ;;  %v1070_v54 = vrot.slane %v386_v19, 2  ;;  %v1069_v57 = vrot.slane %v2468_v17, 2 }
  0x96   : > { %v436_v37 = vsel %vm415_vm5, %v434_v10, %v435_v28  ;;  %v950_v39 = vpack.c.bf16 %v2481_v36, %v439_v31  ;;  %v685_v49 = vsel %vm664_vm7, %v683_v45, %v684_v43  ;;  %v687_v59 = vrot.slane %v2458_v2, 2  ;;  %v2205_v2 = vld [vmem:[%s2668_s3 + $0x60] sm:$0xff]  }
  0x97   : > { %v2487_v40 = vpack.c.bf16 %v439_v31, %v436_v37  ;;  %v949_v41 = vpack.c.bf16 %v436_v37, %v433_v9  ;;  %v1075_v55 = vpack.c.bf16 %v685_v49, %v682_v23  ;;  %v390_v61 = vpack.c.bf16 %v2455_v1, %v2472_v24  ;;  %v2212_v9 = vld [vmem:[%s2668_s3 + $0xf8] sm:$0xff]  }
  0x98   : > { %v1195_v8 = vpack.c.bf16 %v2303_v12, %v2468_v17  ;;  %v820_v12 = vpack.c.bf16 %v2349_v50, %v2336_v42  ;;  %v821_v52 = vpack.c.bf16 %v2472_v24, %v2451_v60  ;;  %v2215_v42 = vld [vmem:[%s2668_s3 + $0x110] sm:$0xff]   ;;  %v822_v50 = vpack.c.bf16 %v2468_v17, %v2455_v1 }
  0x99   : > { %1968 = vmatmul.mubr.msk.bf16.gmra.mrb[4].mxu1 %vm485_vm6, %v2487_v40  ;;  %2031 = vmatprep.mubr.msk.bf16.mxu0 %vm485_vm6, %v949_v41 }
  0x9a   : > { %2032 = vmatmul.mubr.msk.bf16.gmra.mrb[4].mxu0 %vm485_vm6, %v950_v39  ;;  %1979 = vmatprep.mubr.msk.bf16.mxu1 %vm485_vm6, %v387_v38 }
  0x9b   : > { %2043 = vmatprep.mubr.msk.bf16.mxu0 %vm485_vm6, %v1073_v27  ;;  %v2200_v27 = vld [vmem:[%s2668_s3 + $0xc8] sm:$0xff]  }
  0xa1   : > { %1980 = vmatmul.mubr.msk.bf16.vlgmr.msra.gmra.mrb[0].mxu1 %vm485_vm6, %v2359_v56 }
  0xa2   : > { %1983 = vmatprep.mubr.msk.bf16.mxu1 %vm485_vm6, %v389_v53  ;;  %1988 = vmatpush3.bf16.msra.mxu1 %v2426_v18  ;;  %v686_v18 = vrot.slane %v2455_v1, 2 }
  0xa3   : > { %2044 = vmatmul.mubr.msk.bf16.vlgmr.msra.gmra.mrb[0].mxu0 %vm485_vm6, %v1074_v22  ;;  %1989 = vmatprep.subr.bf16.mxu1 %v2199_v51  ;;  %v2530_v22 = vsel %vm664_vm7, %v1069_v57, %v1070_v54 }
  0xa4   : > { %2052 = vmatpush3.bf16.msra.mxu0 %v2431_v32  ;;  %2047 = vmatprep.mubr.msk.bf16.mxu0 %vm485_vm6, %v1075_v55  ;;  %v2203_v32 = vld [vmem:[%s2668_s3 + $0x58] sm:$0xff]   ;;  %v688_v62 = vsel %vm664_vm7, %v686_v18, %v687_v59  ;;  %v1415_v60 = vpack.c.bf16 %v2434_v33, %v2530_v22 }
  0xa5   : > { %2053 = vmatprep.subr.bf16.mxu0 %v2200_v27  ;;  %v1076_v63 = vpack.c.bf16 %v2530_v22, %v688_v62  ;;  %v700_v5 = vpack.c.bf16 %v688_v62, %v685_v49 }
  0xa6   : > { %1990 = vmatpush3.bf16.msra.mxu1 %v2199_v51 }
  0xa7   : > { %1991 = vmatprep.subr.bf16.mxu1 %v2201_v58 }
  0xa8   : > { %2054 = vmatpush3.bf16.msra.mxu0 %v2200_v27 }
  0xa9   : > { %1984 = vmatmul.mubr.msk.bf16.gmra.mrb[4].mxu1 %vm485_vm6, %v390_v61  ;;  %2055 = vmatprep.subr.bf16.mxu0 %v2202_v20 }
  0xaa   : > { %1992 = vmatpush3.bf16.msra.mxu1 %v2201_v58  ;;  %1995 = vmatprep.mubr.msk.bf16.mxu1 %vm485_vm6, %v697_v34  ;;  %v2560_v34 = vpack.c.bf16 %v682_v23, %v2391_v21  ;;  %v2209_v21 = vld [vmem:[%s2668_s3 + $0x70] sm:$0xff]  }
  0xab   : > { %2048 = vmatmul.mubr.msk.bf16.gmra.mrb[4].mxu0 %vm485_vm6, %v1076_v63  ;;  %1993 = vmatprep.subr.bf16.mxu1 %v2203_v32 }
  0xac   : > { %2056 = vmatpush3.bf16.msra.mxu0 %v2202_v20  ;;  %2059 = vmatprep.mubr.msk.bf16.mxu0 %vm485_vm6, %v2359_v56  ;;  %v2208_v56 = vld [vmem:[%s2668_s3 + $0xe8] sm:$0xff]  }
  0xad   : > { %2057 = vmatprep.subr.bf16.mxu0 %v2204_v0 }
  0xae   : > { %1994 = vmatpush3.bf16.msra.mxu1 %v2203_v32 }
  0xaf   : > { %2003 = vmatprep.subr.bf16.mxu1 %v2205_v2 }
  0xb0   : > { %2058 = vmatpush3.bf16.msra.mxu0 %v2204_v0 }
  0xb1   : > { %1996 = vmatmul.mubr.msk.bf16.vlgmr.msra.gmra.mrb[0].mxu1 %vm485_vm6, %v2411_v26  ;;  %2067 = vmatprep.subr.bf16.mxu0 %v2206_v3 }
  0xb2   : > { %1999 = vmatprep.mubr.msk.bf16.mxu1 %vm485_vm6, %v2560_v34  ;;  %2004 = vmatpush3.bf16.msra.mxu1 %v2205_v2 }
  0xb3   : > { %2060 = vmatmul.mubr.msk.bf16.vlgmr.msra.gmra.mrb[0].mxu0 %vm485_vm6, %v389_v53  ;;  %2005 = vmatprep.subr.bf16.mxu1 %v2207_v16 }
  0xb4   : > { %2068 = vmatpush3.bf16.msra.mxu0 %v2206_v3  ;;  %2063 = vmatprep.mubr.msk.bf16.mxu0 %vm485_vm6, %v390_v61 }
  0xb5   : > { %2069 = vmatprep.subr.bf16.mxu0 %v2208_v56 }
  0xb6   : > { %2006 = vmatpush3.bf16.msra.mxu1 %v2207_v16 }
  0xb7   : > { %2007 = vmatprep.subr.bf16.mxu1 %v2209_v21 }
  0xb8   : > { %2070 = vmatpush3.bf16.msra.mxu0 %v2208_v56 }
  0xb9   : > { %2000 = vmatmul.mubr.msk.bf16.gmra.mrb[4].mxu1 %vm485_vm6, %v700_v5  ;;  %2071 = vmatprep.subr.bf16.mxu0 %v2210_v6 }
  0xba   : > { %2008 = vmatpush3.bf16.msra.mxu1 %v2209_v21  ;;  %2011 = vmatprep.mubr.msk.bf16.mxu1 %vm485_vm6, %v819_v35  ;;  %v1305_v35 = vpack.c.bf16 %v2340_v44, %v2481_v36 }
  0xbb   : > { %2064 = vmatmul.mubr.msk.bf16.gmra.mrb[4].mxu0 %vm485_vm6, %v1195_v8  ;;  %2009 = vmatprep.subr.bf16.mxu1 %v2211_v7 }
  0xbc   : > { %2072 = vmatpush3.bf16.msra.mxu0 %v2210_v6  ;;  %2075 = vmatprep.mubr.msk.bf16.mxu0 %vm485_vm6, %v2373_v11  ;;  %v2216_v11 = vld [vmem:[%s2668_s3 + $0x118] sm:$0xff]  }
  0xbd   : > { %2073 = vmatprep.subr.bf16.mxu0 %v2212_v9 }
  0xbe   : > { %2010 = vmatpush3.bf16.msra.mxu1 %v2211_v7 }
  0xbf   : > { %2099 = vmatprep.subr.bf16.mxu1 %v2213_v13 }
  0xc0   : > { %2074 = vmatpush3.bf16.msra.mxu0 %v2212_v9 }
  0xc1   : > { %2012 = vmatmul.mubr.msk.bf16.vlgmr.msra.gmra.mrb[0].mxu1 %vm485_vm6, %v820_v12  ;;  %2083 = vmatprep.subr.bf16.mxu0 %v2213_v13 }
  0xc2   : > { %2015 = vmatprep.mubr.msk.bf16.mxu1 %vm485_vm6, %v821_v52  ;;  %2103 = vmatpush3.bf16.msra.mxu1 %v2213_v13 }
  0xc3   : > { %2076 = vmatmul.mubr.msk.bf16.vlgmr.msra.gmra.mrb[0].mxu0 %vm485_vm6, %v2465_v15  ;;  %2100 = vmatprep.subr.bf16.mxu1 %v2214_v47 }
  0xc4   : > { %2084 = vmatpush3.bf16.msra.mxu0 %v2213_v13  ;;  %2079 = vmatprep.mubr.msk.bf16.mxu0 %vm485_vm6, %v2487_v40  ;;  %v1876_v40 = vld [vmem:[%s2669_s4] ss:$0 sm:$0xff] }
  0xc5   : > { %2085 = vmatprep.subr.bf16.mxu0 %v2214_v47 }
  0xc6   : > { %2104 = vmatpush3.bf16.msra.mxu1 %v2214_v47 }
  0xc7   : > { %2101 = vmatprep.subr.bf16.mxu1 %v2215_v42 }
  0xc8   : > { %2086 = vmatpush3.bf16.msra.mxu0 %v2214_v47 }
  0xc9   : > { %2016 = vmatmul.mubr.msk.bf16.gmra.mrb[4].mxu1 %vm485_vm6, %v822_v50  ;;  %2087 = vmatprep.subr.bf16.mxu0 %v2215_v42 }
  0xca   : > { %2105 = vmatpush3.bf16.msra.mxu1 %v2215_v42  ;;  %2095 = vmatprep.mubr.msk.bf16.mxu1 %vm485_vm6, %v700_v5 }
  0xcb   : > { %2080 = vmatmul.mubr.msk.bf16.gmra.mrb[4].mxu0 %vm485_vm6, %v1305_v35  ;;  %2102 = vmatprep.subr.bf16.mxu1 %v2216_v11 }
  0xcc   : > { %2088 = vmatpush3.bf16.msra.mxu0 %v2215_v42  ;;  %2091 = vmatprep.mubr.msk.bf16.mxu0 %vm485_vm6, %v2411_v26  ;;  %v1548_v26 = vlaneseq }
  0xcd   : > { %2089 = vmatprep.subr.bf16.mxu0 %v2216_v11 }
  0xce   : > { %2106 = vmatpush3.bf16.msra.mxu1 %v2216_v11  ;;  %v1549_v37 = vshrl.u32 %v1548_v26, 7 }
  0xd0   : > { %2090 = vmatpush3.bf16.msra.mxu0 %v2216_v11  ;;  %v1551_v43 = vadd.s32 16, %v1549_v37  ;;  %v1553_v23 = vadd.s32 32, %v1549_v37  ;;  %v1557_v59 = vand.u32 9, %v1549_v37  ;;  %v1555_v2 = vadd.s32 48, %v1549_v37 }
  0xd1   : > { %2096 = vmatmul.mubr.msk.bf16.vlgmr.msra.gmra.mrb[8].mxu1 %vm485_vm6, %v1415_v60 }
  0xd2   : > { %v1559_v61 = vand.u32 9, %v1551_v43  ;;  %v1561_v3 = vand.u32 9, %v1553_v23  ;;  %vm1565_vm12 = vcmp.eq.s32.totalorder %v1557_v59, 0  ;;  %v1563_v21 = vand.u32 9, %v1555_v2 }
  0xd3   : > { %2092 = vmatmul.mubr.msk.bf16.vlgmr.msra.gmra.mrb[0].mxu0 %vm485_vm6, %v2560_v34  ;;  %v1877_v6 = vsel %vm1565_vm12, 1.0, %v2225_v4 }
  0xd4   : > { %vm1567_vm13 = vcmp.eq.s32.totalorder %v1559_v61, 0  ;;  %vm1569_vm14 = vcmp.eq.s32.totalorder %v1561_v3, 0  ;;  %vm1571_vm15 = vcmp.eq.s32.totalorder %v1563_v21, 0 }
  0xd5   : > { %v1878_v5 = vsel %vm1567_vm13, 1.0, %v2225_v4  ;;  %v1879_v42 = vsel %vm1569_vm14, 1.0, %v2225_v4 }
 0x194   : > { %v2013_v44 = vpop.f32.mrb[0].mxu1 }
 0x195   : > { %v902_v1 = vpop.f32.mrb[1].mxu1 }
 0x196   : > { %v2014_v14 = vpop.f32.mrb[2].mxu1 }
 0x197   : > { %v905_v15 = vpop.f32.mrb[3].mxu1 }
 0x19c   : > { %v2017_v17 = vpop.f32.mrb[4].mxu1 }
 0x19d   : > { %v918_v19 = vpop.f32.mrb[5].mxu1 }
 0x19e   : > { %v2081_v24 = vpop.f32.mrb[4].mxu0  ;;  %v2018_v25 = vpop.f32.mrb[6].mxu1 }
 0x19f   : > { %v2111_v28 = vadd.f32 %v2081_v24, %v2017_v17  ;;  %v1392_v29 = vpop.f32.mrb[5].mxu0  ;;  %v921_v33 = vpop.f32.mrb[7].mxu1 }
 0x1a0   : > { %v2113_v30 = vadd.f32 %v1392_v29, %v918_v19  ;;  %v2082_v10 = vpop.f32.mrb[6].mxu0  ;;  %v1880_v19 = vsel %vm1571_vm15, 1.0, %v2225_v4 }
 0x1a1   : > { %v2115_v31 = vadd.f32 %v2082_v10, %v2018_v25  ;;  %v1395_v36 = vpop.f32.mrb[7].mxu0 }
 0x1a2   : > { %v2117_v38 = vadd.f32 %v1395_v36, %v921_v33 }
 0x1a4   : > { %v2097_v39 = vpop.f32.mrb[8].mxu1 }
 0x1a5   : > { %v2112_v41 = vadd.f32 %v2111_v28, %v2097_v39  ;;  %v1502_v45 = vpop.f32.mrb[9].mxu1 }
 0x1a6   : > { %v2093_v46 = vpop.f32.mrb[0].mxu0  ;;  %v2114_v48 = vadd.f32 %v2113_v30, %v1502_v45  ;;  %v2098_v49 = vpop.f32.mrb[10].mxu1 }
 0x1a7   : > { %v2638_v51 = vadd.f32 %v2112_v41, %v1876_v40  ;;  %v2107_v53 = vadd.f32 %v2093_v46, %v2013_v44  ;;  %v1486_v27 = vpop.f32.mrb[1].mxu0  ;;  %v2116_v54 = vadd.f32 %v2115_v31, %v2098_v49  ;;  %v1505_v55 = vpop.f32.mrb[11].mxu1 }
 0x1a8   : > { %v1536_v57 = vadd.f32 %v2114_v48, %v1876_v40  ;;  %v2108_v58 = vadd.f32 %v1486_v27, %v902_v1  ;;  %v2094_v18 = vpop.f32.mrb[2].mxu0  ;;  %v2118_v20 = vadd.f32 %v2117_v38, %v1505_v55 }
 0x1a9   : > { %1546 = vst [vmem:[%s2636_s23 + $0x30] sm:$0xff] %v2638_v51  ;;  %v1534_v22 = vadd.f32 %v2107_v53, %v1876_v40  ;;  %v1539_v32 = vadd.f32 %v2116_v54, %v1876_v40  ;;  %v1489_v62 = vpop.f32.mrb[3].mxu0  ;;  %v2109_v0 = vadd.f32 %v2094_v18, %v2014_v14  ;;  %v1616_v33 = vmul.f32 %v2638_v51, %v2638_v51 }
 0x1aa   : > { %1544 = vst [vmem:[%s2636_s23 + $0x20] sm:$0xff] %v1536_v57  ;;  %v1532_v63 = vadd.f32 %v2108_v58, %v1876_v40  ;;  %v1537_v34 = vadd.f32 %v2118_v20, %v1876_v40  ;;  %v2110_v56 = vadd.f32 %v1489_v62, %v905_v15  ;;  %v1614_v44 = vmul.f32 %v1536_v57, %v1536_v57 }
 0x1ab   : > { %1542 = vst [vmem:[%s2636_s23 + $0x10] sm:$0xff] %v1534_v22  ;;  %1547 = vst [vmem:[%s2636_s23 + $0x38] sm:$0xff] %v1539_v32  ;;  %v1535_v16 = vadd.f32 %v2109_v0, %v1876_v40  ;;  %v1612_v9 = vmul.f32 %v1534_v22, %v1534_v22  ;;  %v1591_v52 = vmul.f32 %v1878_v5, %v1534_v22  ;;  %v1596_v43 = vmul.f32 0.0, %v1539_v32 }
 0x1ac   : > { %1540 = vst [vmem:[%s2636_s23] sm:$0xff] %v1532_v63  ;;  %1545 = vst [vmem:[%s2636_s23 + $0x28] sm:$0xff] %v1537_v34  ;;  %v1610_v7 = vmul.f32 %v1532_v63, %v1532_v63  ;;  %v1533_v8 = vadd.f32 %v2110_v56, %v1876_v40  ;;  %v1589_v13 = vmul.f32 %v1877_v6, %v1532_v63  ;;  %v1594_v10 = vmul.f32 0.0, %v1537_v34 }
 0x1ad   : > { %1543 = vst [vmem:[%s2636_s23 + $0x18] sm:$0xff] %v1535_v16  ;;  %v1613_v11 = vmul.f32 %v1535_v16, %v1535_v16  ;;  %v1620_v1 = vmul.f32 %v1878_v5, %v1612_v9  ;;  %v1592_v14 = vmul.f32 0.0, %v1535_v16  ;;  %v1593_v26 = vmul.f32 %v1879_v42, %v1536_v57 }
 0x1ae   : > { %1541 = vst [vmem:[%s2636_s23 + $0x8] sm:$0xff] %v1533_v8  ;;  %v1590_v12 = vmul.f32 0.0, %v1533_v8  ;;  %v1611_v47 = vmul.f32 %v1533_v8, %v1533_v8  ;;  %v1618_v50 = vmul.f32 %v1877_v6, %v1610_v7  ;;  %v1615_v25 = vmul.f32 %v1537_v34, %v1537_v34 }
 0x1af   : > { %v1621_v24 = vmul.f32 0.0, %v1613_v11  ;;  %v1622_v30 = vmul.f32 %v1879_v42, %v1614_v44  ;;  %v1595_v37 = vmul.f32 %v1880_v19, %v2638_v51  ;;  %v1617_v38 = vmul.f32 %v1539_v32, %v1539_v32 }
 0x1b0   : > { %v1597_v35 = vadd.f32 %v1590_v12, %v1589_v13  ;;  %v1619_v60 = vmul.f32 0.0, %v1611_v47  ;;  %v1623_v39 = vmul.f32 0.0, %v1615_v25  ;;  %v1624_v41 = vmul.f32 %v1880_v19, %v1616_v33 }
 0x1b1   : > { %v1625_v48 = vmul.f32 0.0, %v1617_v38 }
 0x1b2   : > { %v1598_v15 = vadd.f32 %v1597_v35, %v1591_v52  ;;  %v1626_v17 = vadd.f32 %v1619_v60, %v1618_v50 }
 0x1b4   : > { %v1599_v28 = vadd.f32 %v1598_v15, %v1592_v14  ;;  %v1627_v29 = vadd.f32 %v1626_v17, %v1620_v1 }
 0x1b6   : > { %v1600_v31 = vadd.f32 %v1599_v28, %v1593_v26  ;;  %v1628_v36 = vadd.f32 %v1627_v29, %v1621_v24 }
 0x1b8   : > { %v1601_v40 = vadd.f32 %v1600_v31, %v1594_v10  ;;  %v1629_v4 = vadd.f32 %v1628_v36, %v1622_v30 }
 0x1ba   : > { %v1602_v45 = vadd.f32 %v1601_v40, %v1595_v37  ;;  %v1630_v46 = vadd.f32 %v1629_v4, %v1623_v39 }
 0x1bc   : > { %v1603_v49 = vadd.f32 %v1602_v45, %v1596_v43  ;;  %v1631_v53 = vadd.f32 %v1630_v46, %v1624_v41 }
 0x1be   : > { %v1604_v23 = vrot.slane %v1603_v49, 4  ;;  %v1632_v27 = vadd.f32 %v1631_v53, %v1625_v48 }
 0x1c0   : > { %v1605_v54 = vadd.f32 %v1604_v23, %v1603_v49  ;;  %v1633_v55 = vrot.slane %v1632_v27, 4 }
 0x1c2   : > { %v1606_v57 = vrot.slane %v1605_v54, 2  ;;  %v1634_v58 = vadd.f32 %v1633_v55, %v1632_v27 }
 0x1c4   : > { %v1607_v51 = vadd.f32 %v1606_v57, %v1605_v54  ;;  %v1635_v59 = vrot.slane %v1634_v58, 2 }
 0x1c6   : > { %v1608_v18 = vrot.slane %v1607_v51, 1  ;;  %v1636_v20 = vadd.f32 %v1635_v59, %v1634_v58 }
 0x1c8   : > { %v1637_v22 = vrot.slane %v1636_v20, 1  ;;  %v1609_v61 = vadd.f32 %v1608_v18, %v1607_v51 }
 0x1ca   : > { %v1638_v32 = vadd.f32 %v1637_v22, %v1636_v20 }
 0x1cc   : > { %v1639_v62 = vsel %vm368_vm0, %v1609_v61, %v1638_v32 }
 0x1cd   : > { %1640 = vst [vmem:[%s265_s27] sm:$0x3] %v1639_v62 }
 0x1ce PF: > { %s17_s21 = sadd.s32 1, %s2223_s21  }
 0x1cf   : > { %p14_p6 = scmp.ge.s32.totalorder %s17_s21, 4  }
 0x1d1   :  { %16 = sbr.rel (!%p14_p6) target bundleno = 1 (0x1), region = 90 }

// kernel: discriminator_forward.3
= control target key start
LH: loop header
LB: loop body
LE: loop exit
PB: predicated region body
PF: predicated region fallthrough
CT: control target
= control target key end

     0   :  { %s2808_s21 = smov 0   ;;  %s3364_s0 = inlined_call_operand.vmem [shape: bf16[2,8,8,64], index: 0, kind: input, shape index: {}]   ;;  %s3365_s1 = inlined_call_operand.vmem [shape: bf16[64,128], index: 1, kind: input, shape index: {}]   ;;  %s3366_s2 = inlined_call_operand.vmem [shape: f32[1,128], index: 2, kind: input, shape index: {}]   ;;  %s3367_s3 = inlined_call_operand.vmem [shape: bf16[9,128,64], index: 3, kind: input, shape index: {}]   ;;  %s3368_s4 = inlined_call_operand.vmem [shape: f32[1,64], index: 4, kind: input, shape index: {}]   ;;  %s3369_s5 = inlined_call_operand.vmem [shape: f32[64,128], index: 5, kind: output, shape index: {0}]   ;;  %s3370_s6 = inlined_call_operand.vmem [shape: f32[2,2,128], index: 6, kind: output, shape index: {1}]  }
   0x1 LB: > { %s2814_s22 = sadd.s32 4294967295, %s2769_s21   ;;  %p1978_p0 = scmp.ge.s32.totalorder %s2769_s21, 1  ;;  %s2769_s21 = sphi %s2808_s21, %s17_s21  }
   0x2   : > { %p215_p1 = scmp.lt.s32.totalorder %s2769_s21, 3 }
   0x4   : > { %p216_p2 = pnand %p1978_p0, %p215_p1 }
   0x5   : > { %v2683_v0 = vld [vmem:[%s3365_s1] sm:$0xff] (!%p216_p2)   ;;  %p249_p3 = scmp.lt.s32.totalorder (!%p216_p2), %s2814_s22, 1  ;;  %v2684_v1 = vld [vmem:[%s3365_s1 + $0x8] sm:$0xff] (!%p216_p2)   ;;  %v2685_v2 = vld [vmem:[%s3365_s1 + $0x10] sm:$0xff] (!%p216_p2)   ;;  %vm332_vm0 = vcmask (!%p216_p2), 523264   ;;  %v2771_v26 = vmov (!%p216_p2), 0.0  }
   0x6   : > { %219 = sbr.rel (%p216_p2) target bundleno = 752 (0x2f0), region = 40  ;;  %2377 = vmatprep.subr.bf16.mxu0 (!%p216_p2), %v2683_v0  ;;  %v2692_v3 = vld [vmem:[%s3367_s3 + $0x100] sm:$0xff] (!%p216_p2)   ;;  %v2686_v5 = vld [vmem:[%s3365_s1 + $0x18] sm:$0xff] (!%p216_p2)   ;;  %v2694_v7 = vld [vmem:[%s3367_s3 + $0x108] sm:$0xff] (!%p216_p2)   ;;  %v2902_v27 = vrot.slane (!%p216_p2), %v2771_v26, 7  ;;  %vm461_vm1 = vcmask (!%p216_p2), 1040384  }
   0x7   : > { %2378 = vmatpush3.bf16.msra.mxu0 (!%p216_p2), %v2683_v0  ;;  %2489 = vmatprep.subr.bf16.mxu1 (!%p216_p2), %v2692_v3  ;;  %v2691_v6 = vld [vmem:[%s3367_s3 + $0x40] sm:$0xff] (!%p216_p2)   ;;  %v2696_v10 = vld [vmem:[%s3367_s3 + $0x110] sm:$0xff] (!%p216_p2)   ;;  %v2693_v11 = vld [vmem:[%s3367_s3 + $0x48] sm:$0xff] (!%p216_p2)   ;;  %vm516_vm2 = vcmask (!%p216_p2), 1046528   ;;  %vm796_vm11 = vcmask (!%p216_p2), 1045504   ;;  %s2772_s13 = smov (!%p216_p2), 64  }
   0x8   : > { %2379 = vmatprep.subr.bf16.mxu0 (!%p216_p2), %v2684_v1  ;;  %2490 = vmatpush3.bf16.msra.mxu1 (!%p216_p2), %v2692_v3  ;;  %v2698_v12 = vld [vmem:[%s3367_s3 + $0x118] sm:$0xff] (!%p216_p2)   ;;  %v2695_v13 = vld [vmem:[%s3367_s3 + $0x50] sm:$0xff] (!%p216_p2)   ;;  %v2699_v16 = vld [vmem:[%s3367_s3 + $0x60] sm:$0xff] (!%p216_p2)   ;;  %v2909_v29 = vsel (!%p216_p2), %vm461_vm1, 0.0, %v2902_v27  ;;  %v2913_v30 = vsel (!%p216_p2), %vm461_vm1, %v2902_v27, 0.0  ;;  %s1981_s14 = sshll.u32 (!%p216_p2), %s2814_s22, 2 }
   0x9   : > { %2491 = vmatprep.subr.bf16.mxu1 (!%p216_p2), %v2694_v7  ;;  %v2697_v15 = vld [vmem:[%s3367_s3 + $0x58] sm:$0xff] (!%p216_p2)   ;;  %v2700_v17 = vld [vmem:[%s3367_s3 + $0x120] sm:$0xff] (!%p216_p2)   ;;  %v2701_v18 = vld [vmem:[%s3367_s3 + $0x68] sm:$0xff] (!%p216_p2)   ;;  %v517_v34 = vrot.slane (!%p216_p2), %v2909_v29, 1  ;;  %v518_v35 = vrot.slane (!%p216_p2), %v2913_v30, 1  ;;  %v797_v51 = vrot.slane (!%p216_p2), %v2909_v29, 2 }
   0xa   : > { %v2702_v19 = vld [vmem:[%s3367_s3 + $0x128] sm:$0xff] (!%p216_p2)   ;;  %v2703_v20 = vld [vmem:[%s3367_s3 + $0x70] sm:$0xff] (!%p216_p2)   ;;  %v2705_v22 = vld [vmem:[%s3367_s3 + $0x78] sm:$0xff] (!%p216_p2)   ;;  %v798_v52 = vrot.slane (!%p216_p2), %v2913_v30, 2  ;;  %p255_p4 = scmp.lt.s32.totalorder (!%p216_p2), %s1981_s14, 7 }
   0xb   : > { %2380 = vmatpush3.bf16.msra.mxu0 (!%p216_p2), %v2684_v1  ;;  %v2704_v21 = vld [vmem:[%s3367_s3 + $0x130] sm:$0xff] (!%p216_p2)   ;;  %v2706_v23 = vld [vmem:[%s3367_s3 + $0x138] sm:$0xff] (!%p216_p2)   ;;  %v2893_v24 = vld [vmem:[%s3367_s3] sm:$0xff] (!%p216_p2)   ;;  %v2918_v45 = vsel (!%p216_p2), %vm516_vm2, %v517_v34, %v518_v35 }
   0xc   : > { %2381 = vmatprep.subr.bf16.mxu0 (!%p216_p2), %v2685_v2  ;;  %2492 = vmatpush3.bf16.msra.mxu1 (!%p216_p2), %v2694_v7  ;;  %v2898_v25 = vld [vmem:[%s3367_s3 + $0x140] sm:$0xff] (!%p216_p2)   ;;  %vm3031_vm12 = vmneg (!%p216_p2), %vm461_vm1 }
   0xd   : > { %s2826_s27 = scalar_select %p249_p3, %s2814_s22, 1  ;;  %2493 = vmatprep.subr.bf16.mxu1 %v2696_v10  ;;  %v1984_v28 = vld [vmem:[%s3366_s2] ss:$0 sm:$0xff]  ;;  %vm3061_vm13 = vmpackc.low %vm3031_vm12, %vm3031_vm12 }
   0xe   : > { %s3376_s14 = smov (!%p255_p4, %s1981_s14), 7 }
   0xf   : > { %s2260_s30 = sshll.u32 %s2826_s27, 5  ;;  %2382 = vmatpush3.bf16.msra.mxu0 %v2685_v2  ;;  %s1982_s15 = sshll.u32 %s3376_s14, 3 }
  0x10   : > { %s253_s9 = scalar_lea.vmem %s3364_s0, %s2260_s30  ;;  %2383 = vmatprep.subr.bf16.mxu0 %v2686_v5  ;;  %2494 = vmatpush3.bf16.msra.mxu1 %v2696_v10  ;;  %s258_s18 = scalar_lea.vmem %s3369_s5, %s1982_s15 }
  0x11   : > { %v2687_v4 = vld [vmem:[%s253_s9] sm:$0xff]   ;;  %v2688_v8 = vld [vmem:[%s253_s9 + $0x8] sm:$0xff]   ;;  %v2689_v9 = vld [vmem:[%s253_s9 + $0x10] sm:$0xff]   ;;  %2495 = vmatprep.subr.bf16.mxu1 %v2698_v12  ;;  %s1983_s22 = sshll.u32 %s2826_s27, 1 }
  0x12   : > { %2385 = vmatprep.mubr.msk.bf16.mxu0 %vm332_vm0, %v2687_v4  ;;  %v2690_v14 = vld [vmem:[%s253_s9 + $0x18] sm:$0xff]   ;;  %s263_s23 = scalar_lea.vmem %s3370_s6, %s1983_s22 }
  0x13   : > { %2384 = vmatpush3.bf16.msra.mxu0 %v2686_v5 }
  0x14   : > { %2393 = vmatprep.subr.bf16.mxu0 %v2691_v6  ;;  %2496 = vmatpush3.bf16.msra.mxu1 %v2698_v12 }
  0x15   : > { %2497 = vmatprep.subr.bf16.mxu1 %v2700_v17 }
  0x16   : > { %2386 = vmatmul.mubr.msk.bf16.vlgmr.msra.gmra.mrb[0].mxu0 %vm332_vm0, %v2688_v8 }
  0x17   : > { %2389 = vmatprep.mubr.msk.bf16.mxu0 %vm332_vm0, %v2689_v9  ;;  %2394 = vmatpush3.bf16.msra.mxu0 %v2691_v6 }
  0x18   : > { %2395 = vmatprep.subr.bf16.mxu0 %v2693_v11  ;;  %2498 = vmatpush3.bf16.msra.mxu1 %v2700_v17 }
  0x19   : > { %2499 = vmatprep.subr.bf16.mxu1 %v2702_v19 }
  0x1b   : > { %2396 = vmatpush3.bf16.msra.mxu0 %v2693_v11 }
  0x1c   : > { %2397 = vmatprep.subr.bf16.mxu0 %v2695_v13  ;;  %2500 = vmatpush3.bf16.msra.mxu1 %v2702_v19 }
  0x1d   : > { %2501 = vmatprep.subr.bf16.mxu1 %v2704_v21 }
  0x1e   : > { %2390 = vmatmul.mubr.msk.bf16.gmra.mrb[4].mxu0 %vm332_vm0, %v2690_v14 }
  0x1f   : > { %2398 = vmatpush3.bf16.msra.mxu0 %v2695_v13 }
  0x20   : > { %2399 = vmatprep.subr.bf16.mxu0 %v2697_v15  ;;  %2502 = vmatpush3.bf16.msra.mxu1 %v2704_v21 }
  0x21   : > { %2503 = vmatprep.subr.bf16.mxu1 %v2706_v23 }
  0x23   : > { %2400 = vmatpush3.bf16.msra.mxu0 %v2697_v15 }
  0x24   : > { %2401 = vmatprep.subr.bf16.mxu0 %v2699_v16  ;;  %2504 = vmatpush3.bf16.msra.mxu1 %v2706_v23 }
  0x25   : > { %2513 = vmatprep.subr.bf16.mxu1 %v2898_v25 }
  0x27   : > { %2402 = vmatpush3.bf16.msra.mxu0 %v2699_v16 }
  0x28   : > { %2403 = vmatprep.subr.bf16.mxu0 %v2701_v18 }
  0x2b   : > { %2404 = vmatpush3.bf16.msra.mxu0 %v2701_v18 }
  0x2c   : > { %2405 = vmatprep.subr.bf16.mxu0 %v2703_v20 }
  0x2f   : > { %2406 = vmatpush3.bf16.msra.mxu0 %v2703_v20 }
  0x30   : > { %2407 = vmatprep.subr.bf16.mxu0 %v2705_v22 }
  0x33   : > { %2408 = vmatpush3.bf16.msra.mxu0 %v2705_v22 }
  0x34   : > { %2417 = vmatprep.subr.bf16.mxu0 %v2893_v24 }
  0xe9   : > { %v2387_v31 = vpop.f32.mrb[0].mxu0 }
  0xea   : > { %v388_v32 = vadd.f32 %v2387_v31, %v1984_v28  ;;  %v379_v33 = vpop.f32.mrb[1].mxu0 }
  0xeb   : > { %v380_v36 = vadd.f32 %v1984_v28, %v379_v33  ;;  %v2388_v37 = vpop.f32.mrb[2].mxu0 }
  0xec   : > { %vm412_vm3 = vcmp.gt.f32.partialorder %v388_v32, 0.0  ;;  %v420_v38 = vmul.f32 0.2, %v388_v32  ;;  %v391_v39 = vadd.f32 %v2388_v37, %v1984_v28  ;;  %v382_v40 = vpop.f32.mrb[3].mxu0 }
  0xed   : > { %vm410_vm4 = vcmp.gt.f32.partialorder %v380_v36, 0.0  ;;  %v418_v41 = vmul.f32 0.2, %v380_v36  ;;  %v383_v42 = vadd.f32 %v1984_v28, %v382_v40 }
  0xee   : > { %v428_v43 = vsel %vm412_vm3, %v388_v32, %v420_v38  ;;  %vm413_vm5 = vcmp.gt.f32.partialorder %v391_v39, 0.0  ;;  %v421_v44 = vmul.f32 0.2, %v391_v39  ;;  %v2709_v38 = vld [vmem:[%s3367_s3 + $0x8] sm:$0xff]  }
  0xef   : > { %v2920_v46 = vrot.slane %v428_v43, 7  ;;  %v426_v47 = vsel %vm410_vm4, %v380_v36, %v418_v41  ;;  %vm411_vm6 = vcmp.gt.f32.partialorder %v383_v42, 0.0  ;;  %v419_v48 = vmul.f32 0.2, %v383_v42 }
  0xf0   : > { %v2922_v49 = vrot.slane %v426_v47, 7  ;;  %v429_v50 = vsel %vm413_vm5, %v391_v39, %v421_v44 }
  0xf1   : > { %v2928_v53 = vsel %vm461_vm1, 0.0, %v2920_v46  ;;  %v2932_v54 = vsel %vm461_vm1, %v2920_v46, 0.0  ;;  %v2934_v55 = vrot.slane %v429_v50, 7  ;;  %v427_v56 = vsel %vm411_vm6, %v383_v42, %v419_v48  ;;  %v2391_v57 = vpop.f32.mrb[4].mxu0 }
  0xf2   : > { %v526_v58 = vrot.slane %v2928_v53, 1  ;;  %v527_v59 = vrot.slane %v2932_v54, 1  ;;  %v2938_v60 = vrot.slane %v427_v56, 7  ;;  %v404_v61 = vadd.f32 %v2391_v57, %v1984_v28  ;;  %v395_v62 = vpop.f32.mrb[5].mxu0 }
  0xf3   : > { %v2105_v63 = vpack.c.bf16 %v2934_v55, %v2920_v46  ;;  %v396_v0 = vadd.f32 %v1984_v28, %v395_v62  ;;  %v2392_v1 = vpop.f32.mrb[6].mxu0  ;;  %v2944_v2 = vsel %vm461_vm1, 0.0, %v2922_v49  ;;  %v2948_v3 = vsel %vm461_vm1, %v2922_v49, 0.0 }
  0xf4   : > { %v2952_v4 = vsel %vm461_vm1, 0.0, %v2938_v60  ;;  %v2956_v5 = vsel %vm461_vm1, %v2938_v60, 0.0  ;;  %v2960_v6 = vpack.c.bf16 %v2920_v46, %v2938_v60  ;;  %vm416_vm7 = vcmp.gt.f32.partialorder %v404_v61, 0.0  ;;  %v398_v7 = vpop.f32.mrb[7].mxu0  ;;  %v2757_v46 = vld [vmem:[%s3367_s3 + $0x210] sm:$0xff]  }
  0xf5   : > { %v523_v8 = vrot.slane %v2952_v4, 1  ;;  %v524_v9 = vrot.slane %v2956_v5, 1  ;;  %v424_v10 = vmul.f32 0.2, %v404_v61  ;;  %vm414_vm8 = vcmp.gt.f32.partialorder %v396_v0, 0.0 }
  0xf6   : > { %v422_v11 = vmul.f32 0.2, %v396_v0  ;;  %v407_v12 = vadd.f32 %v2392_v1, %v1984_v28  ;;  %v399_v13 = vadd.f32 %v1984_v28, %v398_v7  ;;  %v520_v14 = vrot.slane %v2944_v2, 1  ;;  %v2711_v7 = vld [vmem:[%s3367_s3 + $0x10] sm:$0xff]  }
  0xf7   : > { %v432_v15 = vsel %vm416_vm7, %v404_v61, %v424_v10  ;;  %v521_v16 = vrot.slane %v2948_v3, 1  ;;  %v525_v17 = vsel %vm516_vm2, %v523_v8, %v524_v9  ;;  %v528_v18 = vsel %vm516_vm2, %v526_v58, %v527_v59  ;;  %v2710_v61 = vld [vmem:[%s3367_s3 + $0x148] sm:$0xff]  }
  0xf8   : > { %v2968_v19 = vrot.slane %v432_v15, 7  ;;  %v430_v20 = vsel %vm414_vm8, %v396_v0, %v422_v11  ;;  %vm417_vm9 = vcmp.gt.f32.partialorder %v407_v12, 0.0  ;;  %v425_v21 = vmul.f32 0.2, %v407_v12 }
  0xf9   : > { %v2970_v22 = vrot.slane %v430_v20, 7  ;;  %vm415_vm10 = vcmp.gt.f32.partialorder %v399_v13, 0.0  ;;  %v423_v23 = vmul.f32 0.2, %v399_v13  ;;  %v522_v26 = vsel %vm516_vm2, %v520_v14, %v521_v16 }
  0xfa   : > { %v433_v28 = vsel %vm417_vm9, %v407_v12, %v425_v21  ;;  %v549_v31 = vpack.c.bf16 %v522_v26, %v2918_v45  ;;  %v2974_v32 = vpack.c.bf16 %v528_v18, %v525_v17  ;;  %v1119_v33 = vpack.c.bf16 %v525_v17, %v522_v26  ;;  %v2712_v26 = vld [vmem:[%s3367_s3 + $0x150] sm:$0xff]   ;;  %v2716_v12 = vld [vmem:[%s3367_s3 + $0x160] sm:$0xff]  }
  0xfb   : > { %v2976_v34 = vrot.slane %v433_v28, 7  ;;  %v431_v35 = vsel %vm415_vm10, %v399_v13, %v423_v23  ;;  %v2980_v36 = vsel %vm461_vm1, 0.0, %v2934_v55  ;;  %v475_v37 = vsel %vm461_vm1, %v2934_v55, 0.0 }
  0xfc   : > { %v2987_v39 = vrot.slane %v431_v35, 7  ;;  %2409 = vmatprep.mubr.bf16.mxu0 %v549_v31  ;;  %2505 = vmatprep.mubr.bf16.mxu1 %v1119_v33  ;;  %v529_v40 = vrot.slane %v2980_v36, 1  ;;  %v530_v41 = vrot.slane %v475_v37, 1  ;;  %v809_v42 = vrot.slane %v2980_v36, 2 }
  0xfd   : > { %2410 = vmatmul.mubr.bf16.vlgmr.msra.gmra.mrb[8].mxu0 %v2974_v32  ;;  %v810_v43 = vrot.slane %v475_v37, 2  ;;  %v2994_v44 = vsel %vm461_vm1, 0.0, %v2970_v22  ;;  %v2998_v47 = vsel %vm461_vm1, %v2970_v22, 0.0  ;;  %v3002_v48 = vsel %vm461_vm1, 0.0, %v2968_v19 }
  0xfe   : > { %2418 = vmatpush3.bf16.msra.mxu0 %v2893_v24  ;;  %v531_v50 = vsel %vm516_vm2, %v529_v40, %v530_v41  ;;  %v532_v56 = vrot.slane %v2994_v44, 1  ;;  %v533_v57 = vrot.slane %v2998_v47, 1  ;;  %v3010_v58 = vsel %vm461_vm1, 0.0, %v2987_v39 }
  0xff   : > { %v1120_v59 = vpack.c.bf16 %v531_v50, %v528_v18  ;;  %2419 = vmatprep.subr.bf16.mxu0 %v2709_v38  ;;  %v477_v62 = vsel %vm461_vm1, %v2987_v39, 0.0  ;;  %v3019_v24 = vsel %vm461_vm1, %v2968_v19, 0.0  ;;  %v535_v0 = vrot.slane %v3010_v58, 1 }
 0x100   : > { %v534_v1 = vsel %vm516_vm2, %v532_v56, %v533_v57  ;;  %v536_v8 = vrot.slane %v477_v62, 1  ;;  %v538_v9 = vrot.slane %v3002_v48, 1  ;;  %v539_v10 = vrot.slane %v3019_v24, 1 }
 0x101   : > { %2506 = vmatmul.mubr.bf16.vlgmr.msra.gmra.mrb[0].mxu1 %v1120_v59  ;;  %v3028_v11 = vpack.c.bf16 %v534_v1, %v531_v50  ;;  %v2032_v13 = vpack.c.bf16 %v2922_v49, %v2902_v27  ;;  %v3039_v14 = vsel %vm461_vm1, 0.0, %v2976_v34  ;;  %v3043_v15 = vsel %vm461_vm1, %v2976_v34, 0.0  ;;  %v2715_v59 = vld [vmem:[%s3367_s3 + $0x20] sm:$0xff]  }
 0x102   : > { %2514 = vmatpush3.bf16.msra.mxu1 %v2898_v25  ;;  %2420 = vmatpush3.bf16.msra.mxu0 %v2709_v38  ;;  %v537_v16 = vsel %vm516_vm2, %v535_v0, %v536_v8  ;;  %v540_v17 = vsel %vm516_vm2, %v538_v9, %v539_v10  ;;  %v1115_v18 = vrot.slane %v3039_v14, 1  ;;  %v1116_v20 = vrot.slane %v3043_v15, 1 }
 0x103   : > { %2515 = vmatprep.subr.bf16.mxu1 %v2710_v61  ;;  %2413 = vmatprep.mubr.bf16.mxu0 %v3028_v11  ;;  %v3051_v21 = vpack.c.bf16 %v540_v17, %v537_v16  ;;  %v1121_v23 = vpack.c.bf16 %v537_v16, %v534_v1  ;;  %v800_v25 = vrot.slane %v2944_v2, 2  ;;  %v801_v28 = vrot.slane %v2948_v3, 2  ;;  %v2713_v2 = vld [vmem:[%s3367_s3 + $0x18] sm:$0xff]  }
 0x104   : > { %2421 = vmatprep.subr.bf16.mxu0 %v2711_v7  ;;  %v3066_v33 = vsel %vm516_vm2, %v1115_v18, %v1116_v20  ;;  %v803_v35 = vrot.slane %v2952_v4, 2  ;;  %v804_v36 = vrot.slane %v2956_v5, 2  ;;  %v806_v37 = vrot.slane %v2928_v53, 2  ;;  %v2718_v18 = vld [vmem:[%s3367_s3 + $0x168] sm:$0xff]   ;;  %v2719_v20 = vld [vmem:[%s3367_s3 + $0x30] sm:$0xff]  }
 0x105   : > { %2414 = vmatmul.mubr.bf16.gmra.mrb[12].mxu0 %v3051_v21  ;;  %2509 = vmatprep.mubr.bf16.mxu1 %v1121_v23  ;;  %v1122_v3 = vpack.c.bf16 %v3066_v33, %v540_v17  ;;  %v3077_v38 = vsel %vm796_vm11, %v800_v25, %v801_v28  ;;  %v807_v40 = vrot.slane %v2932_v54, 2  ;;  %v3081_v4 = vsel %vm796_vm11, %v809_v42, %v810_v43  ;;  %v2714_v43 = vld [vmem:[%s3367_s3 + $0x158] sm:$0xff]   ;;  %v2720_v23 = vld [vmem:[%s3367_s3 + $0x170] sm:$0xff]   ;;  %v2723_v28 = vld [vmem:[%s3367_s3 + $0x80] sm:$0xff]  }
 0x106   : > { %2516 = vmatpush3.bf16.msra.mxu1 %v2710_v61  ;;  %2422 = vmatpush3.bf16.msra.mxu0 %v2711_v7  ;;  %v805_v53 = vsel %vm796_vm11, %v803_v35, %v804_v36  ;;  %v3086_v5 = vpack.c.bf16 %v2970_v22, %v2934_v55  ;;  %v812_v41 = vrot.slane %v2994_v44, 2  ;;  %v813_v50 = vrot.slane %v2998_v47, 2  ;;  %v2722_v25 = vld [vmem:[%s3367_s3 + $0x178] sm:$0xff]   ;;  %v2724_v35 = vld [vmem:[%s3367_s3 + $0x180] sm:$0xff]   ;;  %v2725_v36 = vld [vmem:[%s3367_s3 + $0x88] sm:$0xff]  }
 0x107   : > { %2517 = vmatprep.subr.bf16.mxu1 %v2712_v26  ;;  %2433 = vmatprep.mubr.msk.bf16.mxu0 %vm3061_vm13, %v2032_v13  ;;  %v3093_v54 = vsel %vm796_vm11, %v806_v37, %v807_v40  ;;  %v1265_v42 = vpack.c.bf16 %v805_v53, %v3077_v38  ;;  %v815_v56 = vrot.slane %v3010_v58, 2  ;;  %v816_v57 = vrot.slane %v477_v62, 2  ;;  %v2726_v37 = vld [vmem:[%s3367_s3 + $0x188] sm:$0xff]   ;;  %v2729_v40 = vld [vmem:[%s3367_s3 + $0x98] sm:$0xff]  }
 0x108   : > { %v3101_v44 = vpack.c.bf16 %v3093_v54, %v805_v53  ;;  %v1266_v47 = vpack.c.bf16 %v3081_v4, %v3093_v54  ;;  %2423 = vmatprep.subr.bf16.mxu0 %v2713_v2  ;;  %v814_v61 = vsel %vm796_vm11, %v812_v41, %v813_v50  ;;  %v3111_v0 = vpack.c.bf16 %v2968_v19, %v2987_v39  ;;  %v2730_v53 = vld [vmem:[%s3367_s3 + $0x198] sm:$0xff]   ;;  %v2731_v41 = vld [vmem:[%s3367_s3 + $0xa0] sm:$0xff]   ;;  %v2733_v50 = vld [vmem:[%s3367_s3 + $0xa8] sm:$0xff]  }
 0x109   : > { %2510 = vmatmul.mubr.bf16.gmra.mrb[4].mxu1 %v1122_v3  ;;  %v817_v58 = vsel %vm796_vm11, %v815_v56, %v816_v57  ;;  %v818_v62 = vrot.slane %v3002_v48, 2  ;;  %v819_v1 = vrot.slane %v3019_v24, 2  ;;  %v1261_v8 = vrot.slane %v3039_v14, 2  ;;  %v2717_v14 = vld [vmem:[%s3367_s3 + $0x28] sm:$0xff]   ;;  %v2728_v3 = vld [vmem:[%s3367_s3 + $0x190] sm:$0xff]   ;;  %v2738_v56 = vld [vmem:[%s3367_s3 + $0x1b8] sm:$0xff]  }
 0x10a   : > { %2518 = vmatpush3.bf16.msra.mxu1 %v2712_v26  ;;  %2529 = vmatprep.mubr.bf16.mxu1 %v1265_v42  ;;  %v1267_v7 = vpack.c.bf16 %v817_v58, %v814_v61  ;;  %v1262_v9 = vrot.slane %v3043_v15, 2  ;;  %v3119_v10 = vpack.c.bf16 %v814_v61, %v3081_v4  ;;  %v3129_v48 = vsel %vm796_vm11, %v797_v51, %v798_v52  ;;  %v2721_v26 = vld [vmem:[%s3367_s3 + $0x38] sm:$0xff]   ;;  %v2734_v54 = vld [vmem:[%s3367_s3 + $0x1a8] sm:$0xff]   ;;  %v2736_v42 = vld [vmem:[%s3367_s3 + $0x1b0] sm:$0xff]  }
 0x10b   : > { %2424 = vmatpush3.bf16.msra.mxu0 %v2713_v2  ;;  %2519 = vmatprep.subr.bf16.mxu1 %v2714_v43  ;;  %v820_v24 = vsel %vm796_vm11, %v818_v62, %v819_v1  ;;  %v2100_v13 = vpack.c.bf16 %v2938_v60, %v2922_v49  ;;  %v2110_v29 = vpack.c.bf16 %v2987_v39, %v2970_v22  ;;  %v2727_v2 = vld [vmem:[%s3367_s3 + $0x90] sm:$0xff]   ;;  %v2739_v57 = vld [vmem:[%s3367_s3 + $0xc0] sm:$0xff]   ;;  %v2742_v61 = vld [vmem:[%s3367_s3 + $0x1c8] sm:$0xff]  }
 0x10c   : > { %2425 = vmatprep.subr.bf16.mxu0 %v2715_v59  ;;  %v3138_v15 = vsel %vm796_vm11, %v1261_v8, %v1262_v9  ;;  %v3140_v16 = vpack.c.bf16 %v820_v24, %v817_v58  ;;  %v2115_v30 = vpack.c.bf16 %v2976_v34, %v2968_v19  ;;  %v1546_v52 = vpack.c.bf16 %v2918_v45, %v3066_v33  ;;  %v2743_v58 = vld [vmem:[%s3367_s3 + $0xd0] sm:$0xff]   ;;  %v2745_v1 = vld [vmem:[%s3367_s3 + $0xd8] sm:$0xff]   ;;  %v2749_v49 = vld [vmem:[%s3367_s3 + $0xe8] sm:$0xff]  }
 0x10d   : > { %v1268_v51 = vpack.c.bf16 %v3138_v15, %v820_v24  ;;  %v1685_v17 = vpack.c.bf16 %v3129_v48, %v3138_v15  ;;  %v829_v4 = vpack.c.bf16 %v3077_v38, %v3129_v48  ;;  %v2732_v38 = vld [vmem:[%s3367_s3 + $0x1a0] sm:$0xff]   ;;  %v2744_v62 = vld [vmem:[%s3367_s3 + $0x1d0] sm:$0xff]   ;;  %v2750_v60 = vld [vmem:[%s3367_s3 + $0x1e8] sm:$0xff]  }
 0x10e   : > { %2520 = vmatpush3.bf16.msra.mxu1 %v2714_v43  ;;  %v2737_v43 = vld [vmem:[%s3367_s3 + $0xb8] sm:$0xff]   ;;  %v2752_v8 = vld [vmem:[%s3367_s3 + $0x1f0] sm:$0xff]   ;;  %v2755_v24 = vld [vmem:[%s3367_s3 + $0x200] sm:$0xff]  }
 0x10f   : > { %2426 = vmatpush3.bf16.msra.mxu0 %v2715_v59  ;;  %2521 = vmatprep.subr.bf16.mxu1 %v2716_v12  ;;  %v2741_v59 = vld [vmem:[%s3367_s3 + $0xc8] sm:$0xff]   ;;  %v2753_v9 = vld [vmem:[%s3367_s3 + $0xf8] sm:$0xff]   ;;  %v2761_v45 = vld [vmem:[%s3367_s3 + $0x230] sm:$0xff]  }
 0x110   : > { %2427 = vmatprep.subr.bf16.mxu0 %v2717_v14  ;;  %v2758_v55 = vld [vmem:[%s3367_s3 + $0x218] sm:$0xff]   ;;  %v2760_v19 = vld [vmem:[%s3367_s3 + $0x228] sm:$0xff]  }
 0x111   : > { %v2762_v22 = vld [vmem:[%s3367_s3 + $0x238] sm:$0xff]  }
 0x112   : > { %2522 = vmatpush3.bf16.msra.mxu1 %v2716_v12  ;;  %v2754_v12 = vld [vmem:[%s3367_s3 + $0x1f8] sm:$0xff]  }
 0x113   : > { %2428 = vmatpush3.bf16.msra.mxu0 %v2717_v14  ;;  %2523 = vmatprep.subr.bf16.mxu1 %v2718_v18 }
 0x114   : > { %2429 = vmatprep.subr.bf16.mxu0 %v2719_v20 }
 0x116   : > { %2524 = vmatpush3.bf16.msra.mxu1 %v2718_v18 }
 0x117   : > { %2430 = vmatpush3.bf16.msra.mxu0 %v2719_v20  ;;  %2525 = vmatprep.subr.bf16.mxu1 %v2720_v23 }
 0x118   : > { %2431 = vmatprep.subr.bf16.mxu0 %v2721_v26 }
 0x11a   : > { %2526 = vmatpush3.bf16.msra.mxu1 %v2720_v23 }
 0x11b   : > { %2432 = vmatpush3.bf16.msra.mxu0 %v2721_v26  ;;  %2527 = vmatprep.subr.bf16.mxu1 %v2722_v25 }
 0x11c   : > { %2441 = vmatprep.subr.bf16.mxu0 %v2723_v28 }
 0x11e   : > { %2528 = vmatpush3.bf16.msra.mxu1 %v2722_v25  ;;  %2434 = vmatmul.mubr.msk.bf16.vlgmr.msra.gmra.mrb[8].mxu0 %vm3061_vm13, %v2960_v6 }
 0x11f   : > { %2437 = vmatprep.mubr.msk.bf16.mxu0 %vm3061_vm13, %v3086_v5  ;;  %2442 = vmatpush3.bf16.msra.mxu0 %v2723_v28 }
 0x120   : > { %2537 = vmatprep.subr.bf16.mxu1 %v2724_v35  ;;  %2443 = vmatprep.subr.bf16.mxu0 %v2725_v36 }
 0x121   : > { %2530 = vmatmul.mubr.bf16.vlgmr.msra.gmra.mrb[0].mxu1 %v1266_v47  ;;  %v2740_v47 = vld [vmem:[%s3367_s3 + $0x1c0] sm:$0xff]  }
 0x122   : > { %2533 = vmatprep.mubr.bf16.mxu1 %v1267_v7  ;;  %2538 = vmatpush3.bf16.msra.mxu1 %v2724_v35  ;;  %v2747_v7 = vld [vmem:[%s3367_s3 + $0xe0] sm:$0xff]  }
 0x123   : > { %2444 = vmatpush3.bf16.msra.mxu0 %v2725_v36  ;;  %2539 = vmatprep.subr.bf16.mxu1 %v2726_v37 }
 0x124   : > { %2445 = vmatprep.subr.bf16.mxu0 %v2727_v2 }
 0x126   : > { %2540 = vmatpush3.bf16.msra.mxu1 %v2726_v37  ;;  %2438 = vmatmul.mubr.msk.bf16.gmra.mrb[12].mxu0 %vm3061_vm13, %v3111_v0 }
 0x127   : > { %2446 = vmatpush3.bf16.msra.mxu0 %v2727_v2  ;;  %2457 = vmatprep.mubr.bf16.mxu0 %v829_v4 }
 0x128   : > { %2541 = vmatprep.subr.bf16.mxu1 %v2728_v3  ;;  %2447 = vmatprep.subr.bf16.mxu0 %v2729_v40 }
 0x129   : > { %2534 = vmatmul.mubr.bf16.gmra.mrb[4].mxu1 %v1268_v51 }
 0x12a   : > { %2542 = vmatpush3.bf16.msra.mxu1 %v2728_v3  ;;  %2553 = vmatprep.mubr.msk.bf16.mxu1 %vm3061_vm13, %v2960_v6  ;;  %v2735_v6 = vld [vmem:[%s3367_s3 + $0xb0] sm:$0xff]  }
 0x12b   : > { %2448 = vmatpush3.bf16.msra.mxu0 %v2729_v40  ;;  %2543 = vmatprep.subr.bf16.mxu1 %v2730_v53 }
 0x12c   : > { %2449 = vmatprep.subr.bf16.mxu0 %v2731_v41 }
 0x12e   : > { %2544 = vmatpush3.bf16.msra.mxu1 %v2730_v53 }
 0x12f   : > { %2450 = vmatpush3.bf16.msra.mxu0 %v2731_v41  ;;  %2545 = vmatprep.subr.bf16.mxu1 %v2732_v38 }
 0x130   : > { %2451 = vmatprep.subr.bf16.mxu0 %v2733_v50 }
 0x132   : > { %2546 = vmatpush3.bf16.msra.mxu1 %v2732_v38 }
 0x133   : > { %2452 = vmatpush3.bf16.msra.mxu0 %v2733_v50  ;;  %2547 = vmatprep.subr.bf16.mxu1 %v2734_v54 }
 0x134   : > { %2453 = vmatprep.subr.bf16.mxu0 %v2735_v6 }
 0x136   : > { %2548 = vmatpush3.bf16.msra.mxu1 %v2734_v54 }
 0x137   : > { %2454 = vmatpush3.bf16.msra.mxu0 %v2735_v6  ;;  %2549 = vmatprep.subr.bf16.mxu1 %v2736_v42 }
 0x138   : > { %2455 = vmatprep.subr.bf16.mxu0 %v2737_v43 }
 0x13a   : > { %2550 = vmatpush3.bf16.msra.mxu1 %v2736_v42 }
 0x13b   : > { %2456 = vmatpush3.bf16.msra.mxu0 %v2737_v43  ;;  %2551 = vmatprep.subr.bf16.mxu1 %v2738_v56 }
 0x13c   : > { %2465 = vmatprep.subr.bf16.mxu0 %v2739_v57 }
 0x13e   : > { %2552 = vmatpush3.bf16.msra.mxu1 %v2738_v56  ;;  %2458 = vmatmul.mubr.bf16.vlgmr.msra.gmra.mrb[8].mxu0 %v3101_v44 }
 0x13f   : > { %2461 = vmatprep.mubr.bf16.mxu0 %v3119_v10  ;;  %2466 = vmatpush3.bf16.msra.mxu0 %v2739_v57 }
 0x140   : > { %2561 = vmatprep.subr.bf16.mxu1 %v2740_v47  ;;  %2467 = vmatprep.subr.bf16.mxu0 %v2741_v59 }
 0x141   : > { %2554 = vmatmul.mubr.msk.bf16.vlgmr.msra.gmra.mrb[0].mxu1 %vm3061_vm13, %v3086_v5  ;;  %v2207_v5 = vpack.c.bf16 %v2902_v27, %v2976_v34  ;;  %v2748_v27 = vld [vmem:[%s3367_s3 + $0x1e0] sm:$0xff]  }
 0x142   : > { %2557 = vmatprep.mubr.msk.bf16.mxu1 %vm3061_vm13, %v3111_v0  ;;  %2562 = vmatpush3.bf16.msra.mxu1 %v2740_v47  ;;  %v2746_v0 = vld [vmem:[%s3367_s3 + $0x1d8] sm:$0xff]  }
 0x143   : > { %2468 = vmatpush3.bf16.msra.mxu0 %v2741_v59  ;;  %2563 = vmatprep.subr.bf16.mxu1 %v2742_v61 }
 0x144   : > { %2469 = vmatprep.subr.bf16.mxu0 %v2743_v58 }
 0x146   : > { %2564 = vmatpush3.bf16.msra.mxu1 %v2742_v61  ;;  %2462 = vmatmul.mubr.bf16.gmra.mrb[12].mxu0 %v3140_v16 }
 0x147   : > { %2470 = vmatpush3.bf16.msra.mxu0 %v2743_v58  ;;  %2481 = vmatprep.mubr.msk.bf16.mxu0 %vm3061_vm13, %v2100_v13  ;;  %v2756_v13 = vld [vmem:[%s3367_s3 + $0x208] sm:$0xff]  }
 0x148   : > { %2565 = vmatprep.subr.bf16.mxu1 %v2744_v62  ;;  %2471 = vmatprep.subr.bf16.mxu0 %v2745_v1 }
 0x149   : > { %2558 = vmatmul.mubr.msk.bf16.gmra.mrb[4].mxu1 %vm3061_vm13, %v2207_v5 }
 0x14a   : > { %2566 = vmatpush3.bf16.msra.mxu1 %v2744_v62  ;;  %2577 = vmatprep.mubr.bf16.mxu1 %v2974_v32  ;;  %v2751_v32 = vld [vmem:[%s3367_s3 + $0xf0] sm:$0xff]  }
 0x14b   : > { %2472 = vmatpush3.bf16.msra.mxu0 %v2745_v1  ;;  %2567 = vmatprep.subr.bf16.mxu1 %v2746_v0 }
 0x14c   : > { %2473 = vmatprep.subr.bf16.mxu0 %v2747_v7 }
 0x14e   : > { %2568 = vmatpush3.bf16.msra.mxu1 %v2746_v0 }
 0x14f   : > { %2474 = vmatpush3.bf16.msra.mxu0 %v2747_v7  ;;  %2569 = vmatprep.subr.bf16.mxu1 %v2748_v27 }
 0x150   : > { %2475 = vmatprep.subr.bf16.mxu0 %v2749_v49 }
 0x152   : > { %2570 = vmatpush3.bf16.msra.mxu1 %v2748_v27 }
 0x153   : > { %2476 = vmatpush3.bf16.msra.mxu0 %v2749_v49  ;;  %2571 = vmatprep.subr.bf16.mxu1 %v2750_v60 }
 0x154   : > { %2477 = vmatprep.subr.bf16.mxu0 %v2751_v32 }
 0x156   : > { %2572 = vmatpush3.bf16.msra.mxu1 %v2750_v60 }
 0x157   : > { %2478 = vmatpush3.bf16.msra.mxu0 %v2751_v32  ;;  %2573 = vmatprep.subr.bf16.mxu1 %v2752_v8 }
 0x158   : > { %2479 = vmatprep.subr.bf16.mxu0 %v2753_v9 }
 0x15a   : > { %2574 = vmatpush3.bf16.msra.mxu1 %v2752_v8 }
 0x15b   : > { %2480 = vmatpush3.bf16.msra.mxu0 %v2753_v9  ;;  %2575 = vmatprep.subr.bf16.mxu1 %v2754_v12 }
 0x15e   : > { %2576 = vmatpush3.bf16.msra.mxu1 %v2754_v12  ;;  %2482 = vmatmul.mubr.msk.bf16.vlgmr.msra.gmra.mrb[8].mxu0 %vm3061_vm13, %v2105_v63  ;;  %v2759_v63 = vld [vmem:[%s3367_s3 + $0x220] sm:$0xff]  }
 0x15f   : > { %2485 = vmatprep.mubr.msk.bf16.mxu0 %vm3061_vm13, %v2110_v29  ;;  %2585 = vmatprep.subr.bf16.mxu1 %v2755_v24 }
 0x161   : > { %2578 = vmatmul.mubr.bf16.vlgmr.msra.gmra.mrb[0].mxu1 %v3028_v11 }
 0x162   : > { %2581 = vmatprep.mubr.bf16.mxu1 %v3051_v21  ;;  %2586 = vmatpush3.bf16.msra.mxu1 %v2755_v24 }
 0x163   : > { %2587 = vmatprep.subr.bf16.mxu1 %v2756_v13 }
 0x166   : > { %2588 = vmatpush3.bf16.msra.mxu1 %v2756_v13  ;;  %2486 = vmatmul.mubr.msk.bf16.gmra.mrb[12].mxu0 %vm3061_vm13, %v2115_v30  ;;  %v2257_v30 = vld [vmem:[%s3368_s4] ss:$0 sm:$0xff] }
 0x167   : > { %2589 = vmatprep.subr.bf16.mxu1 %v2757_v46 }
 0x169   : > { %2582 = vmatmul.mubr.bf16.gmra.mrb[4].mxu1 %v1546_v52 }
 0x16a   : > { %2590 = vmatpush3.bf16.msra.mxu1 %v2757_v46  ;;  %2601 = vmatprep.mubr.bf16.mxu1 %v3101_v44 }
 0x16b   : > { %2591 = vmatprep.subr.bf16.mxu1 %v2758_v55 }
 0x16e   : > { %2592 = vmatpush3.bf16.msra.mxu1 %v2758_v55 }
 0x16f   : > { %2593 = vmatprep.subr.bf16.mxu1 %v2759_v63 }
 0x172   : > { %2594 = vmatpush3.bf16.msra.mxu1 %v2759_v63 }
 0x173   : > { %2595 = vmatprep.subr.bf16.mxu1 %v2760_v19 }
 0x176   : > { %2596 = vmatpush3.bf16.msra.mxu1 %v2760_v19 }
 0x177   : > { %2597 = vmatprep.subr.bf16.mxu1 %v2761_v45 }
 0x17a   : > { %2598 = vmatpush3.bf16.msra.mxu1 %v2761_v45 }
 0x17b   : > { %2599 = vmatprep.subr.bf16.mxu1 %v2762_v22 }
 0x17e   : > { %2600 = vmatpush3.bf16.msra.mxu1 %v2762_v22 }
 0x181   : > { %2602 = vmatmul.mubr.bf16.vlgmr.msra.gmra.mrb[0].mxu1 %v3119_v10 }
 0x182   : > { %2605 = vmatprep.mubr.bf16.mxu1 %v3140_v16 }
 0x189   : > { %2606 = vmatmul.mubr.bf16.gmra.mrb[4].mxu1 %v1685_v17 }
 0x231   : > { %v2483_v34 = vpop.f32.mrb[8].mxu0 }
 0x232   : > { %v1074_v39 = vpop.f32.mrb[9].mxu0 }
 0x233   : > { %v2484_v11 = vpop.f32.mrb[10].mxu0 }
 0x234   : > { %v1077_v21 = vpop.f32.mrb[11].mxu0 }
 0x239   : > { %v2487_v31 = vpop.f32.mrb[12].mxu0 }
 0x23a   : > { %v1090_v33 = vpop.f32.mrb[13].mxu0 }
 0x23b   : > { %v2488_v44 = vpop.f32.mrb[14].mxu0 }
 0x23c   : > { %v1093_v14 = vpop.f32.mrb[15].mxu0 }
 0x254   : > { %v2603_v29 = vpop.f32.mrb[0].mxu1 }
 0x255   : > { %v2609_v10 = vadd.f32 %v2603_v29, %v2483_v34  ;;  %v1785_v51 = vpop.f32.mrb[1].mxu1 }
 0x256   : > { %v2610_v16 = vadd.f32 %v1785_v51, %v1074_v39  ;;  %v2604_v52 = vpop.f32.mrb[2].mxu1 }
 0x257   : > { %v1833_v18 = vadd.f32 %v2609_v10, %v2257_v30  ;;  %v2611_v48 = vadd.f32 %v2604_v52, %v2484_v11  ;;  %v1788_v15 = vpop.f32.mrb[3].mxu1 }
 0x258   : > { %v1831_v17 = vadd.f32 %v2610_v16, %v2257_v30  ;;  %v2612_v20 = vadd.f32 %v1788_v15, %v1077_v21 }
 0x259   : > { %v1834_v23 = vadd.f32 %v2611_v48, %v2257_v30 }
 0x25a   : > { %v1832_v26 = vadd.f32 %v2612_v20, %v2257_v30 }
 0x25c   : > { %v2607_v25 = vpop.f32.mrb[4].mxu1 }
 0x25d   : > { %v2613_v28 = vadd.f32 %v2607_v25, %v2487_v31  ;;  %v1801_v35 = vpop.f32.mrb[5].mxu1 }
 0x25e   : > { %v2614_v36 = vadd.f32 %v1801_v35, %v1090_v33  ;;  %v2608_v37 = vpop.f32.mrb[6].mxu1 }
 0x25f   : > { %v2615_v2 = vadd.f32 %v2608_v37, %v2488_v44  ;;  %v1804_v3 = vpop.f32.mrb[7].mxu1  ;;  %v1837_v40 = vadd.f32 %v2613_v28, %v2257_v30 }
 0x260   : > { %v2616_v4 = vadd.f32 %v1804_v3, %v1093_v14  ;;  %v1835_v53 = vadd.f32 %v2614_v36, %v2257_v30 }
 0x261   : > { %1847 = vrot.lane.b32.xlu1 %v1837_v40, %s2772_s13  ;;  %v1838_v41 = vadd.f32 %v2615_v2, %v2257_v30 }
 0x262   : > { %1843 = vrot.lane.b32.xlu0 %v1835_v53, %s2772_s13  ;;  %v1836_v38 = vadd.f32 %v2616_v4, %v2257_v30 }
 0x265   : > { %1849 = vrot.lane.b32.xlu1 %v1838_v41, %s2772_s13 }
 0x266   : > { %1845 = vrot.lane.b32.xlu0 %v1836_v38, %s2772_s13 }
 0x2d3   : > { %v1848_v50 = vpop.permute.xlu1 %1847 }
 0x2d4   : > { %v1844_v54 = vpop.permute.xlu0 %1843  ;;  %v1857_v56 = vsel %vm332_vm0, %v1833_v18, %v1848_v50 }
 0x2d5   : > { %v1855_v6 = vsel %vm332_vm0, %v1831_v17, %v1844_v54  ;;  %1861 = vst [vmem:[%s258_s18 + $0x10] sm:$0xff] %v1857_v56  ;;  %v1874_v62 = vmul.f32 %v1857_v56, %v1857_v56 }
 0x2d6   : > { %1859 = vst [vmem:[%s258_s18] sm:$0xff] %v1855_v6  ;;  %v1872_v47 = vmul.f32 %v1855_v6, %v1855_v6 }
 0x2d7   : > { %v1850_v42 = vpop.permute.xlu1 %1849 }
 0x2d8   : > { %v1846_v43 = vpop.permute.xlu0 %1845  ;;  %v1858_v58 = vsel %vm332_vm0, %v1834_v23, %v1850_v42 }
 0x2d9   : > { %v1856_v57 = vsel %vm332_vm0, %v1832_v26, %v1846_v43  ;;  %1862 = vst [vmem:[%s258_s18 + $0x18] sm:$0xff] %v1858_v58  ;;  %v1875_v0 = vmul.f32 %v1858_v58, %v1858_v58 }
 0x2da   : > { %1860 = vst [vmem:[%s258_s18 + $0x8] sm:$0xff] %v1856_v57  ;;  %v1863_v59 = vadd.f32 %v1856_v57, %v1855_v6  ;;  %v1873_v61 = vmul.f32 %v1856_v57, %v1856_v57 }
 0x2dc   : > { %v1864_v1 = vadd.f32 %v1863_v59, %v1857_v56  ;;  %v1876_v5 = vadd.f32 %v1873_v61, %v1872_v47 }
 0x2de   : > { %v1865_v7 = vadd.f32 %v1864_v1, %v1858_v58  ;;  %v1877_v27 = vadd.f32 %v1876_v5, %v1874_v62 }
 0x2e0   : > { %v1866_v49 = vrot.slane %v1865_v7, 4  ;;  %v1878_v60 = vadd.f32 %v1877_v27, %v1875_v0 }
 0x2e2   : > { %v1867_v32 = vadd.f32 %v1866_v49, %v1865_v7  ;;  %v1879_v8 = vrot.slane %v1878_v60, 4 }
 0x2e4   : > { %v1868_v9 = vrot.slane %v1867_v32, 2  ;;  %v1880_v12 = vadd.f32 %v1879_v8, %v1878_v60 }
 0x2e6   : > { %v1869_v24 = vadd.f32 %v1868_v9, %v1867_v32  ;;  %v1881_v13 = vrot.slane %v1880_v12, 2 }
 0x2e8   : > { %v1870_v46 = vrot.slane %v1869_v24, 1  ;;  %v1882_v55 = vadd.f32 %v1881_v13, %v1880_v12 }
 0x2ea   : > { %v1883_v63 = vrot.slane %v1882_v55, 1  ;;  %v1871_v19 = vadd.f32 %v1870_v46, %v1869_v24 }
 0x2ec   : > { %v1884_v45 = vadd.f32 %v1883_v63, %v1882_v55 }
 0x2ee   : > { %v1885_v22 = vsel %vm461_vm1, %v1871_v19, %v1884_v45 }
 0x2ef   : > { %1886 = vst [vmem:[%s263_s23] sm:$0x3] %v1885_v22 }
 0x2f0 PF: > { %s17_s21 = sadd.s32 1, %s2769_s21  }
 0x2f1   : > { %p14_p5 = scmp.ge.s32.totalorder %s17_s21, 4  }
 0x2f3   :  { %16 = sbr.rel (!%p14_p5) target bundleno = 1 (0x1), region = 90 }

</bundles_post_ra>
